<compile_context>
chip_gen: v7x
topology: tpu7x:2x2x1
jax: 0.10.0
libtpu: 0.0.40
codegen_flags: <defaults>
</compile_context>

<pallas_src>
import functools

import numpy as np
import jax
import jax.numpy as jnp
from jax.experimental import pallas as pl
from jax.experimental.pallas import tpu as pltpu

V_TH = 0.5      # IF-node firing threshold
LEAK = 0.1      # LeakyReLU negative slope
BN_EPS = 1e-5


def _round_up(v, m):
    return ((v + m - 1) // m) * m


def _block_kernel(x_ref, m_ref, s_ref, w1_ref, w2_ref, w3_ref, wd_ref,
                  bn1_ref, bn2_ref, bn3_ref, bnd_ref,
                  o_ref, col_ref, *, W):
    L = x_ref.shape[-1]                              # batch_tile * padded H*W (lanes)

    def affine(v, bn_ref):                           # eval-mode BN (scale/shift)
        return v * bn_ref[:, 0:1] + bn_ref[:, 1:2]

    def spike(v, bn_ref):
        # Folded BN + IF heaviside:  scale*v + shift >= V_TH  <=>  scale*v >= V_TH - shift
        # (bn_ref[:, 1] holds the precomputed per-channel threshold V_TH - shift).
        return jnp.where(v * bn_ref[:, 0:1] >= bn_ref[:, 1:2],
                         1.0, 0.0).astype(jnp.float32)

    def conv3x3(act, w_ref):
        # im2col: 9 lane-rolls + boundary masks, stored directly as bf16 into the shared
        # scratch, then one bf16 MXU matmul with (Cout, 9*Cin) weights (f32 accumulate).
        cin = act.shape[0]
        for k in range(9):
            dy, dx = k // 3, k % 3
            off = (dy - 1) * W + (dx - 1)            # flat spatial offset of tap k
            shifted = pltpu.roll(act, shift=(-off) % L, axis=1) if off else act
            col_ref[k * cin:(k + 1) * cin, :] = (
                shifted * m_ref[k:k + 1, :]).astype(col_ref.dtype)
        return jnp.dot(w_ref[...], col_ref[0:9 * cin, :],
                       preferred_element_type=jnp.float32)

    x = x_ref[0]                                     # (Cin, L) f32

    out = spike(x, bn1_ref)                          # bn1 + node1 (folded)
    out = conv3x3(out, w1_ref)                       # conv1  (bf16 MXU, 0/1 input)
    out = spike(out, bn2_ref)                        # bn2 + node2 (folded)
    out = conv3x3(out, w2_ref)                       # conv2  (bf16 MXU, 0/1 input)
    out = conv3x3(out, w3_ref)                       # conv3  (bf16 MXU; input rounded to bf16)
    out = affine(out, bn3_ref)                       # bn3

    # identity = downsample(x) = 1x1 conv (no bias) + BN  (kept f32: raw activation input)
    idn = jnp.dot(wd_ref[...], x, preferred_element_type=jnp.float32)
    idn = affine(idn, bnd_ref)

    z = out + idn
    z = jnp.where(z >= 0, z, LEAK * z)               # LeakyReLU(0.1)

    # MaxPool2d(2): 2x2 window max lands on the (even h, even w) anchor lane ...
    zh = jnp.maximum(z, pltpu.roll(z, shift=L - 1, axis=1))      # max over w, w+1
    zv = jnp.maximum(zh, pltpu.roll(zh, shift=L - W, axis=1))    # max over h, h+1
    # ... then one exact f32 0/1-selection matmul compacts the stride-2 anchors into a
    # lane-dense pooled block (only L/4-sized output written back to HBM).
    o_ref[0] = jnp.dot(zv, s_ref[...], preferred_element_type=jnp.float32)


def _tap_masks(H, W, HWp, B):
    """(9, B*HWp) {0,1} masks: tap k valid where the padded 3x3 read is in-image.

    Pad lanes (flat index >= H*W within each image's HWp block) are always 0."""
    hw = H * W
    hh, ww = np.meshgrid(np.arange(H), np.arange(W), indexing="ij")
    per = np.zeros((9, HWp), np.float32)
    for k in range(9):
        dy, dx = k // 3 - 1, k % 3 - 1
        ok = ((hh + dy >= 0) & (hh + dy < H) &
              (ww + dx >= 0) & (ww + dx < W))
        per[k, :hw] = ok.reshape(-1).astype(np.float32)
    return jnp.asarray(np.tile(per, (1, B)))          # (9, B*HWp)


def _pool_select(H, W, HWp, B, Lp_pad):
    """(B*HWp, Lp_pad) 0/1 matrix gathering (even h, even w) anchors, b-major / row-major."""
    Ho, Wo = H // 2, W // 2
    L = B * HWp
    S = np.zeros((L, Lp_pad), np.float32)
    b, i, j = np.meshgrid(np.arange(B), np.arange(Ho), np.arange(Wo), indexing="ij")
    p = (b * HWp + (2 * i) * W + 2 * j).ravel()
    q = ((b * Ho + i) * Wo + j).ravel()
    S[p, q] = 1.0
    return jnp.asarray(S)


def _pick_batch_tile(N, HWp):
    """Images folded per grid step: target >=1024 lanes, but keep G = N // B >= 2 when
    N >= 2 so the 'parallel' grid axis can split across v7x's two TensorCores (costs
    only ~0.35us/step extra on single-TC v5e/v6e)."""
    bt = min(N, max(1, -(-1024 // HWp)))
    if N >= 2:
        bt = min(bt, N // 2)
    while N % bt:
        bt -= 1
    return max(1, bt)


def init_params(key, inplanes, planes):
    ks = jax.random.split(key, 8)

    def conv_w(k, cin, cout, dtype):
        # torch layout (cout, cin, 3, 3) -> (cout, 9*cin), tap-major columns
        w = 0.1 * jax.random.normal(k, (cout, cin, 3, 3), jnp.float32)
        return jnp.transpose(w, (0, 2, 3, 1)).reshape(cout, 9 * cin).astype(dtype)

    def bn_affine(k, c):
        kg, kb, km, kv = jax.random.split(k, 4)
        gamma = 1.0 + 0.1 * jax.random.normal(kg, (c,), jnp.float32)
        beta = 0.1 * jax.random.normal(kb, (c,), jnp.float32)
        mean = 0.1 * jax.random.normal(km, (c,), jnp.float32)
        var = 0.5 + jnp.abs(jax.random.normal(kv, (c,), jnp.float32))
        scale = gamma / jnp.sqrt(var + BN_EPS)
        shift = beta - mean * scale
        return jnp.stack([scale, shift], axis=1)       # (c, 2)

    wd = 0.1 * jax.random.normal(ks[3], (planes, inplanes, 1, 1), jnp.float32)
    wd = wd[:, :, 0, 0]                                # (planes, inplanes)

    return dict(
        w1=conv_w(ks[0], inplanes, planes, jnp.bfloat16),  # spike input -> lossless bf16
        w2=conv_w(ks[1], planes, planes, jnp.bfloat16),    # spike input -> lossless bf16
        w3=conv_w(ks[2], planes, planes, jnp.bfloat16),    # bf16 MXU path (perf review)
        wd=wd,
        bn1=bn_affine(ks[4], inplanes),
        bn2=bn_affine(ks[5], planes),
        bn3=bn_affine(ks[6], planes),
        bnd=bn_affine(ks[7], planes),
    )


def _block_apply_channel_major(xg, params, *, B, H, W, HWp):
    """Core: takes / returns the channel-major layout.

    xg: (G, Cin, B*HWp) f32.  Returns pooled (G, Cp, Lp_pad) f32 with the first
    B*(H//2)*(W//2) lanes valid.  Multi-block networks should chain this directly
    (keeping activations channel-major between blocks saves two HBM transpose passes
    per block -- perf-review item)."""
    G, Cin, L = xg.shape
    Cp = params["w1"].shape[0]
    Ho, Wo = H // 2, W // 2
    Lp = B * Ho * Wo
    Lp_pad = _round_up(Lp, 128)

    masks = _tap_masks(H, W, HWp, B)                  # (9, L)
    pool_sel = _pool_select(H, W, HWp, B, Lp_pad)     # (L, Lp_pad)

    # Fold eval-mode BN + IF threshold: scale*v + shift >= V_TH <=> scale*v >= V_TH - shift.
    def fold_thr(bn):
        return jnp.stack([bn[:, 0], V_TH - bn[:, 1]], axis=1)

    bn1k, bn2k = fold_thr(params["bn1"]), fold_thr(params["bn2"])

    invariants = (masks, pool_sel, params["w1"], params["w2"], params["w3"],
                  params["wd"], bn1k, bn2k, params["bn3"], params["bnd"])

    def inv_spec(a):
        nd = a.ndim
        # Grid-invariant operand: constant index_map.  (At planes=512 these should be
        # single-buffered via pipeline_mode=pl.Buffered(1); negligible at demo sizes.)
        return pl.BlockSpec(a.shape, lambda g, _nd=nd: (0,) * _nd)

    # VMEM budget derived from the actual tiles: double-buffered x / out blocks,
    # double-buffered invariants, bf16 im2col scratch, ~30% headroom.
    inv_bytes = sum(int(np.prod(a.shape)) * a.dtype.itemsize for a in invariants)
    est = (2 * Cin * L * 4 + 2 * Cp * Lp_pad * 4
           + 9 * max(Cin, Cp) * L * 2 + 2 * inv_bytes)
    vmem_limit = max(32 * 1024 * 1024, int(1.3 * est))
    # TODO(synk): on v7x (64 MiB physical VMEM) keep this + tile pick <= ~48 MiB.

    kernel = functools.partial(_block_kernel, W=W)

    return pl.pallas_call(
        kernel,
        out_shape=jax.ShapeDtypeStruct((G, Cp, Lp_pad), jnp.float32),
        grid_spec=pltpu.PrefetchScalarGridSpec(
            num_scalar_prefetch=0,
            grid=(G,),
            in_specs=[pl.BlockSpec((1, Cin, L), lambda g: (g, 0, 0))]
                     + [inv_spec(a) for a in invariants],
            out_specs=pl.BlockSpec((1, Cp, Lp_pad), lambda g: (g, 0, 0)),
            scratch_shapes=[
                # shared bf16 im2col scratch, reused by all three convs
                pltpu.VMEM((9 * max(Cin, Cp), L), jnp.bfloat16),
            ]),
        compiler_params=pltpu.CompilerParams(
            dimension_semantics=("parallel",),
            vmem_limit_bytes=vmem_limit),
    )(xg, *invariants)


@jax.jit
def block_forward(x_nchw, params):
    N, Cin, H, W = x_nchw.shape
    assert H % 2 == 0 and W % 2 == 0, "MaxPool2d(2) path assumes even H, W"
    Cp = params["w1"].shape[0]
    HW = H * W
    HWp = _round_up(HW, 128)                          # lane-dense per-image spatial length
    B = _pick_batch_tile(N, HWp)                      # images per grid step
    G = N // B
    L = B * HWp

    # NCHW -> (G, Cin, B*HWp): channels on sublanes, batch*spatial (zero-padded) on lanes.
    xf = x_nchw.astype(jnp.float32).reshape(N, Cin, HW)
    if HWp != HW:
        xf = jnp.pad(xf, ((0, 0), (0, 0), (0, HWp - HW)))
    xg = (xf.reshape(G, B, Cin, HWp)
          .transpose(0, 2, 1, 3)
          .reshape(G, Cin, L))

    out = _block_apply_channel_major(xg, params, B=B, H=H, W=W, HWp=HWp)

    # (G, Cp, Lp_pad) pooled, channel-major -> (N, Cp, H/2, W/2)
    Ho, Wo = H // 2, W // 2
    Lp = B * Ho * Wo
    y = (out[:, :, :Lp]
         .reshape(G, Cp, B, Ho, Wo)
         .transpose(0, 2, 1, 3, 4)
         .reshape(N, Cp, Ho, Wo))
    return y


def _ref_forward(x, params):
    """Pure-JAX f32 reference of the same forward pass (eval-mode BN, heaviside spikes)."""
    hi = jax.lax.Precision.HIGHEST

    def bn(v, tab):
        return v * tab[:, 0][None, :, None, None] + tab[:, 1][None, :, None, None]

    def spike(v, tab):
        # identical folded comparison to the kernel (avoids threshold-boundary flips)
        return jnp.where(v * tab[:, 0][None, :, None, None]
                         >= (V_TH - tab[:, 1])[None, :, None, None], 1.0, 0.0)

    def conv(v, w_flat):
        cout = w_flat.shape[0]
        cin = w_flat.shape[1] // 9
        w = w_flat.astype(jnp.float32).reshape(cout, 3, 3, cin).transpose(0, 3, 1, 2)
        return jax.lax.conv_general_dilated(
            v, w, (1, 1), ((1, 1), (1, 1)),
            dimension_numbers=("NCHW", "OIHW", "NCHW"), precision=hi)

    out = spike(x, params["bn1"])
    out = conv(out, params["w1"])
    out = spike(out, params["bn2"])
    out = conv(out, params["w2"])
    out = conv(out, params["w3"])
    out = bn(out, params["bn3"])
    idn = jnp.einsum("oc,nchw->nohw", params["wd"].astype(jnp.float32), x, precision=hi)
    idn = bn(idn, params["bnd"])
    z = out + idn
    z = jnp.where(z >= 0, z, LEAK * z)
    N, C, H, W = z.shape
    return z.reshape(N, C, H // 2, 2, W // 2, 2).max(axis=(3, 5))


if __name__ == "__main__":
    inplanes, planes = 4, 8
    N, H, W = 2, 16, 16

    key = jax.random.PRNGKey(0)
    kx, kp = jax.random.split(key)
    x = jax.random.normal(kx, (N, inplanes, H, W), jnp.float32)
    params = init_params(kp, inplanes, planes)

    y = block_forward(x, params)
    y = jax.block_until_ready(y)

    assert y.shape == (N, planes, H // 2, W // 2), y.shape
    assert bool(jnp.all(jnp.isfinite(y)))

    # Validate against the pure-JAX f32 reference.  bf16 conv3 + summation-order effects
    # give ~1e-3 relative error; allow a small fraction of outliers in case a value sits
    # exactly at the IF firing threshold.
    y_ref = jax.block_until_ready(_ref_forward(x, params))
    rel = jnp.abs(y - y_ref) / jnp.maximum(jnp.abs(y_ref), 0.1)
    frac_ok = float(jnp.mean((rel < 5e-2).astype(jnp.float32)))
    assert frac_ok > 0.85, (frac_ok, float(jnp.max(rel)))

    print("KERNEL_OK")
</pallas_src>

<mosaic_0001>
module attributes {stable_mosaic.version = 11 : i64} {
  func.func @_block_kernel(%arg0: i32, %arg1: memref<1x4x256xf32, #tpu.memory_space<vmem>>, %arg2: memref<9x256xf32, #tpu.memory_space<vmem>>, %arg3: memref<256x128xf32, #tpu.memory_space<vmem>>, %arg4: memref<8x36xbf16, #tpu.memory_space<vmem>>, %arg5: memref<8x72xbf16, #tpu.memory_space<vmem>>, %arg6: memref<8x72xbf16, #tpu.memory_space<vmem>>, %arg7: memref<8x4xf32, #tpu.memory_space<vmem>>, %arg8: memref<4x2xf32, #tpu.memory_space<vmem>>, %arg9: memref<8x2xf32, #tpu.memory_space<vmem>>, %arg10: memref<8x2xf32, #tpu.memory_space<vmem>>, %arg11: memref<8x2xf32, #tpu.memory_space<vmem>>, %arg12: memref<1x8x128xf32, #tpu.memory_space<vmem>>, %arg13: memref<72x256xbf16, #tpu.memory_space<vmem>>) attributes {dimension_semantics = [#tpu.dimension_semantics<parallel>], iteration_bounds = array<i64: 2>, scalar_prefetch = 0 : i64, scratch_operands = 1 : i64, tpu.core_type = #tpu.core_type<tc>, window_params = [{transform_indices = @transform_0, window_bounds = array<i64: 1, 4, 256>}, {pipeline_mode = #tpu.pipeline_mode<synchronous>, transform_indices = @transform_1, window_bounds = array<i64: 9, 256>}, {pipeline_mode = #tpu.pipeline_mode<synchronous>, transform_indices = @transform_2, window_bounds = array<i64: 256, 128>}, {pipeline_mode = #tpu.pipeline_mode<synchronous>, transform_indices = @transform_3, window_bounds = array<i64: 8, 36>}, {pipeline_mode = #tpu.pipeline_mode<synchronous>, transform_indices = @transform_4, window_bounds = array<i64: 8, 72>}, {pipeline_mode = #tpu.pipeline_mode<synchronous>, transform_indices = @transform_5, window_bounds = array<i64: 8, 72>}, {pipeline_mode = #tpu.pipeline_mode<synchronous>, transform_indices = @transform_6, window_bounds = array<i64: 8, 4>}, {pipeline_mode = #tpu.pipeline_mode<synchronous>, transform_indices = @transform_7, window_bounds = array<i64: 4, 2>}, {pipeline_mode = #tpu.pipeline_mode<synchronous>, transform_indices = @transform_8, window_bounds = array<i64: 8, 2>}, {pipeline_mode = #tpu.pipeline_mode<synchronous>, transform_indices = @transform_9, window_bounds = array<i64: 8, 2>}, {pipeline_mode = #tpu.pipeline_mode<synchronous>, transform_indices = @transform_10, window_bounds = array<i64: 8, 2>}, {transform_indices = @transform_11, window_bounds = array<i64: 1, 8, 128>}]} {
    %c0 = arith.constant 0 : index
    %c0_0 = arith.constant 0 : index
    %c0_1 = arith.constant 0 : index
    %0 = vector.load %arg1[%c0, %c0_0, %c0_1] : memref<1x4x256xf32, #tpu.memory_space<vmem>>, vector<1x4x256xf32>
    %1 = vector.shape_cast %0 : vector<1x4x256xf32> to vector<4x256xf32>
    %c0_2 = arith.constant 0 : index
    %c0_3 = arith.constant 0 : index
    %2 = vector.load %arg8[%c0_2, %c0_3] : memref<4x2xf32, #tpu.memory_space<vmem>>, vector<4x1xf32>
    %3 = vector.broadcast %2 : vector<4x1xf32> to vector<4x256xf32>
    %4 = arith.mulf %1, %3 : vector<4x256xf32>
    %c0_4 = arith.constant 0 : index
    %c1 = arith.constant 1 : index
    %5 = vector.load %arg8[%c0_4, %c1] : memref<4x2xf32, #tpu.memory_space<vmem>>, vector<4x1xf32>
    %6 = vector.broadcast %5 : vector<4x1xf32> to vector<4x256xf32>
    %7 = arith.cmpf oge, %4, %6 : vector<4x256xf32>
    %cst = arith.constant 1.000000e+00 : f32
    %cst_5 = arith.constant 0.000000e+00 : f32
    %8 = vector.broadcast %cst : f32 to vector<4x256xf32>
    %9 = vector.broadcast %cst_5 : f32 to vector<4x256xf32>
    %10 = arith.select %7, %8, %9 : vector<4x256xi1>, vector<4x256xf32>
    %c17_i32 = arith.constant 17 : i32
    %11 = tpu.dynamic_rotate %10 by %c17_i32 dim 1 : vector<4x256xf32>, i32 -> vector<4x256xf32>
    %c0_6 = arith.constant 0 : index
    %c0_7 = arith.constant 0 : index
    %12 = vector.load %arg2[%c0_6, %c0_7] : memref<9x256xf32, #tpu.memory_space<vmem>>, vector<1x256xf32>
    %13 = vector.broadcast %12 : vector<1x256xf32> to vector<4x256xf32>
    %14 = arith.mulf %11, %13 : vector<4x256xf32>
    %15 = arith.truncf %14 : vector<4x256xf32> to vector<4x256xbf16>
    %c0_8 = arith.constant 0 : index
    %c0_9 = arith.constant 0 : index
    %16 = vector.load %arg13[%c0_8, %c0_9] : memref<72x256xbf16, #tpu.memory_space<vmem>>, vector<4x256xbf16>
    tpu.vector_store %arg13[%c0_8, %c0_9], %15 {strides = array<i32>} : memref<72x256xbf16, #tpu.memory_space<vmem>>, vector<4x256xbf16>,
    %c16_i32 = arith.constant 16 : i32
    %17 = tpu.dynamic_rotate %10 by %c16_i32 dim 1 : vector<4x256xf32>, i32 -> vector<4x256xf32>
    %c1_10 = arith.constant 1 : index
    %c0_11 = arith.constant 0 : index
    %18 = vector.load %arg2[%c1_10, %c0_11] : memref<9x256xf32, #tpu.memory_space<vmem>>, vector<1x256xf32>
    %19 = vector.broadcast %18 : vector<1x256xf32> to vector<4x256xf32>
    %20 = arith.mulf %17, %19 : vector<4x256xf32>
    %21 = arith.truncf %20 : vector<4x256xf32> to vector<4x256xbf16>
    %c4 = arith.constant 4 : index
    %c0_12 = arith.constant 0 : index
    %22 = vector.load %arg13[%c4, %c0_12] : memref<72x256xbf16, #tpu.memory_space<vmem>>, vector<4x256xbf16>
    tpu.vector_store %arg13[%c4, %c0_12], %21 {strides = array<i32>} : memref<72x256xbf16, #tpu.memory_space<vmem>>, vector<4x256xbf16>,
    %c15_i32 = arith.constant 15 : i32
    %23 = tpu.dynamic_rotate %10 by %c15_i32 dim 1 : vector<4x256xf32>, i32 -> vector<4x256xf32>
    %c2 = arith.constant 2 : index
    %c0_13 = arith.constant 0 : index
    %24 = vector.load %arg2[%c2, %c0_13] : memref<9x256xf32, #tpu.memory_space<vmem>>, vector<1x256xf32>
    %25 = vector.broadcast %24 : vector<1x256xf32> to vector<4x256xf32>
    %26 = arith.mulf %23, %25 : vector<4x256xf32>
    %27 = arith.truncf %26 : vector<4x256xf32> to vector<4x256xbf16>
    %c8 = arith.constant 8 : index
    %c0_14 = arith.constant 0 : index
    %28 = vector.load %arg13[%c8, %c0_14] : memref<72x256xbf16, #tpu.memory_space<vmem>>, vector<4x256xbf16>
    tpu.vector_store %arg13[%c8, %c0_14], %27 {strides = array<i32>} : memref<72x256xbf16, #tpu.memory_space<vmem>>, vector<4x256xbf16>,
    %c1_i32 = arith.constant 1 : i32
    %29 = tpu.dynamic_rotate %10 by %c1_i32 dim 1 : vector<4x256xf32>, i32 -> vector<4x256xf32>
    %c3 = arith.constant 3 : index
    %c0_15 = arith.constant 0 : index
    %30 = vector.load %arg2[%c3, %c0_15] : memref<9x256xf32, #tpu.memory_space<vmem>>, vector<1x256xf32>
    %31 = vector.broadcast %30 : vector<1x256xf32> to vector<4x256xf32>
    %32 = arith.mulf %29, %31 : vector<4x256xf32>
    %33 = arith.truncf %32 : vector<4x256xf32> to vector<4x256xbf16>
    %c12 = arith.constant 12 : index
    %c0_16 = arith.constant 0 : index
    %34 = vector.load %arg13[%c12, %c0_16] : memref<72x256xbf16, #tpu.memory_space<vmem>>, vector<4x256xbf16>
    tpu.vector_store %arg13[%c12, %c0_16], %33 {strides = array<i32>} : memref<72x256xbf16, #tpu.memory_space<vmem>>, vector<4x256xbf16>,
    %c4_17 = arith.constant 4 : index
    %c0_18 = arith.constant 0 : index
    %35 = vector.load %arg2[%c4_17, %c0_18] : memref<9x256xf32, #tpu.memory_space<vmem>>, vector<1x256xf32>
    %36 = vector.broadcast %35 : vector<1x256xf32> to vector<4x256xf32>
    %37 = arith.mulf %10, %36 : vector<4x256xf32>
    %38 = arith.truncf %37 : vector<4x256xf32> to vector<4x256xbf16>
    %c16 = arith.constant 16 : index
    %c0_19 = arith.constant 0 : index
    %39 = vector.load %arg13[%c16, %c0_19] : memref<72x256xbf16, #tpu.memory_space<vmem>>, vector<4x256xbf16>
    tpu.vector_store %arg13[%c16, %c0_19], %38 {strides = array<i32>} : memref<72x256xbf16, #tpu.memory_space<vmem>>, vector<4x256xbf16>,
    %c255_i32 = arith.constant 255 : i32
    %40 = tpu.dynamic_rotate %10 by %c255_i32 dim 1 : vector<4x256xf32>, i32 -> vector<4x256xf32>
    %c5 = arith.constant 5 : index
    %c0_20 = arith.constant 0 : index
    %41 = vector.load %arg2[%c5, %c0_20] : memref<9x256xf32, #tpu.memory_space<vmem>>, vector<1x256xf32>
    %42 = vector.broadcast %41 : vector<1x256xf32> to vector<4x256xf32>
    %43 = arith.mulf %40, %42 : vector<4x256xf32>
    %44 = arith.truncf %43 : vector<4x256xf32> to vector<4x256xbf16>
    %c20 = arith.constant 20 : index
    %c0_21 = arith.constant 0 : index
    %45 = vector.load %arg13[%c20, %c0_21] : memref<72x256xbf16, #tpu.memory_space<vmem>>, vector<4x256xbf16>
    tpu.vector_store %arg13[%c20, %c0_21], %44 {strides = array<i32>} : memref<72x256xbf16, #tpu.memory_space<vmem>>, vector<4x256xbf16>,
    %c241_i32 = arith.constant 241 : i32
    %46 = tpu.dynamic_rotate %10 by %c241_i32 dim 1 : vector<4x256xf32>, i32 -> vector<4x256xf32>
    %c6 = arith.constant 6 : index
    %c0_22 = arith.constant 0 : index
    %47 = vector.load %arg2[%c6, %c0_22] : memref<9x256xf32, #tpu.memory_space<vmem>>, vector<1x256xf32>
    %48 = vector.broadcast %47 : vector<1x256xf32> to vector<4x256xf32>
    %49 = arith.mulf %46, %48 : vector<4x256xf32>
    %50 = arith.truncf %49 : vector<4x256xf32> to vector<4x256xbf16>
    %c24 = arith.constant 24 : index
    %c0_23 = arith.constant 0 : index
    %51 = vector.load %arg13[%c24, %c0_23] : memref<72x256xbf16, #tpu.memory_space<vmem>>, vector<4x256xbf16>
    tpu.vector_store %arg13[%c24, %c0_23], %50 {strides = array<i32>} : memref<72x256xbf16, #tpu.memory_space<vmem>>, vector<4x256xbf16>,
    %c240_i32 = arith.constant 240 : i32
    %52 = tpu.dynamic_rotate %10 by %c240_i32 dim 1 : vector<4x256xf32>, i32 -> vector<4x256xf32>
    %c7 = arith.constant 7 : index
    %c0_24 = arith.constant 0 : index
    %53 = vector.load %arg2[%c7, %c0_24] : memref<9x256xf32, #tpu.memory_space<vmem>>, vector<1x256xf32>
    %54 = vector.broadcast %53 : vector<1x256xf32> to vector<4x256xf32>
    %55 = arith.mulf %52, %54 : vector<4x256xf32>
    %56 = arith.truncf %55 : vector<4x256xf32> to vector<4x256xbf16>
    %c28 = arith.constant 28 : index
    %c0_25 = arith.constant 0 : index
    %57 = vector.load %arg13[%c28, %c0_25] : memref<72x256xbf16, #tpu.memory_space<vmem>>, vector<4x256xbf16>
    tpu.vector_store %arg13[%c28, %c0_25], %56 {strides = array<i32>} : memref<72x256xbf16, #tpu.memory_space<vmem>>, vector<4x256xbf16>,
    %c239_i32 = arith.constant 239 : i32
    %58 = tpu.dynamic_rotate %10 by %c239_i32 dim 1 : vector<4x256xf32>, i32 -> vector<4x256xf32>
    %c8_26 = arith.constant 8 : index
    %c0_27 = arith.constant 0 : index
    %59 = vector.load %arg2[%c8_26, %c0_27] : memref<9x256xf32, #tpu.memory_space<vmem>>, vector<1x256xf32>
    %60 = vector.broadcast %59 : vector<1x256xf32> to vector<4x256xf32>
    %61 = arith.mulf %58, %60 : vector<4x256xf32>
    %62 = arith.truncf %61 : vector<4x256xf32> to vector<4x256xbf16>
    %c32 = arith.constant 32 : index
    %c0_28 = arith.constant 0 : index
    %63 = vector.load %arg13[%c32, %c0_28] : memref<72x256xbf16, #tpu.memory_space<vmem>>, vector<4x256xbf16>
    tpu.vector_store %arg13[%c32, %c0_28], %62 {strides = array<i32>} : memref<72x256xbf16, #tpu.memory_space<vmem>>, vector<4x256xbf16>,
    %c0_29 = arith.constant 0 : index
    %c0_30 = arith.constant 0 : index
    %64 = vector.load %arg4[%c0_29, %c0_30] : memref<8x36xbf16, #tpu.memory_space<vmem>>, vector<8x36xbf16>
    %c0_31 = arith.constant 0 : index
    %c0_32 = arith.constant 0 : index
    %65 = vector.load %arg13[%c0_31, %c0_32] : memref<72x256xbf16, #tpu.memory_space<vmem>>, vector<36x256xbf16>
    %cst_33 = arith.constant dense<0.000000e+00> : vector<8x256xf32>
    %66 = tpu.matmul %64, %65, %cst_33 {dimension_numbers = #tpu.dot_dimension_numbers<[1], [0], [0], [1], [0, 0, 1, 1], [], []>} : vector<8x36xbf16>, vector<36x256xbf16>, vector<8x256xf32> -> vector<8x256xf32>
    %c0_34 = arith.constant 0 : index
    %c0_35 = arith.constant 0 : index
    %67 = vector.load %arg9[%c0_34, %c0_35] : memref<8x2xf32, #tpu.memory_space<vmem>>, vector<8x1xf32>
    %68 = vector.broadcast %67 : vector<8x1xf32> to vector<8x256xf32>
    %69 = arith.mulf %66, %68 : vector<8x256xf32>
    %c0_36 = arith.constant 0 : index
    %c1_37 = arith.constant 1 : index
    %70 = vector.load %arg9[%c0_36, %c1_37] : memref<8x2xf32, #tpu.memory_space<vmem>>, vector<8x1xf32>
    %71 = vector.broadcast %70 : vector<8x1xf32> to vector<8x256xf32>
    %72 = arith.cmpf oge, %69, %71 : vector<8x256xf32>
    %cst_38 = arith.constant 1.000000e+00 : f32
    %cst_39 = arith.constant 0.000000e+00 : f32
    %73 = vector.broadcast %cst_38 : f32 to vector<8x256xf32>
    %74 = vector.broadcast %cst_39 : f32 to vector<8x256xf32>
    %75 = arith.select %72, %73, %74 : vector<8x256xi1>, vector<8x256xf32>
    %c17_i32_40 = arith.constant 17 : i32
    %76 = tpu.dynamic_rotate %75 by %c17_i32_40 dim 1 : vector<8x256xf32>, i32 -> vector<8x256xf32>
    %c0_41 = arith.constant 0 : index
    %c0_42 = arith.constant 0 : index
    %77 = vector.load %arg2[%c0_41, %c0_42] : memref<9x256xf32, #tpu.memory_space<vmem>>, vector<1x256xf32>
    %78 = vector.broadcast %77 : vector<1x256xf32> to vector<8x256xf32>
    %79 = arith.mulf %76, %78 : vector<8x256xf32>
    %80 = arith.truncf %79 : vector<8x256xf32> to vector<8x256xbf16>
    %c0_43 = arith.constant 0 : index
    %c0_44 = arith.constant 0 : index
    %81 = vector.load %arg13[%c0_43, %c0_44] : memref<72x256xbf16, #tpu.memory_space<vmem>>, vector<8x256xbf16>
    tpu.vector_store %arg13[%c0_43, %c0_44], %80 {strides = array<i32>} : memref<72x256xbf16, #tpu.memory_space<vmem>>, vector<8x256xbf16>,
    %c16_i32_45 = arith.constant 16 : i32
    %82 = tpu.dynamic_rotate %75 by %c16_i32_45 dim 1 : vector<8x256xf32>, i32 -> vector<8x256xf32>
    %c1_46 = arith.constant 1 : index
    %c0_47 = arith.constant 0 : index
    %83 = vector.load %arg2[%c1_46, %c0_47] : memref<9x256xf32, #tpu.memory_space<vmem>>, vector<1x256xf32>
    %84 = vector.broadcast %83 : vector<1x256xf32> to vector<8x256xf32>
    %85 = arith.mulf %82, %84 : vector<8x256xf32>
    %86 = arith.truncf %85 : vector<8x256xf32> to vector<8x256xbf16>
    %c8_48 = arith.constant 8 : index
    %c0_49 = arith.constant 0 : index
    %87 = vector.load %arg13[%c8_48, %c0_49] : memref<72x256xbf16, #tpu.memory_space<vmem>>, vector<8x256xbf16>
    tpu.vector_store %arg13[%c8_48, %c0_49], %86 {strides = array<i32>} : memref<72x256xbf16, #tpu.memory_space<vmem>>, vector<8x256xbf16>,
    %c15_i32_50 = arith.constant 15 : i32
    %88 = tpu.dynamic_rotate %75 by %c15_i32_50 dim 1 : vector<8x256xf32>, i32 -> vector<8x256xf32>
    %c2_51 = arith.constant 2 : index
    %c0_52 = arith.constant 0 : index
    %89 = vector.load %arg2[%c2_51, %c0_52] : memref<9x256xf32, #tpu.memory_space<vmem>>, vector<1x256xf32>
    %90 = vector.broadcast %89 : vector<1x256xf32> to vector<8x256xf32>
    %91 = arith.mulf %88, %90 : vector<8x256xf32>
    %92 = arith.truncf %91 : vector<8x256xf32> to vector<8x256xbf16>
    %c16_53 = arith.constant 16 : index
    %c0_54 = arith.constant 0 : index
    %93 = vector.load %arg13[%c16_53, %c0_54] : memref<72x256xbf16, #tpu.memory_space<vmem>>, vector<8x256xbf16>
    tpu.vector_store %arg13[%c16_53, %c0_54], %92 {strides = array<i32>} : memref<72x256xbf16, #tpu.memory_space<vmem>>, vector<8x256xbf16>,
    %c1_i32_55 = arith.constant 1 : i32
    %94 = tpu.dynamic_rotate %75 by %c1_i32_55 dim 1 : vector<8x256xf32>, i32 -> vector<8x256xf32>
    %c3_56 = arith.constant 3 : index
    %c0_57 = arith.constant 0 : index
    %95 = vector.load %arg2[%c3_56, %c0_57] : memref<9x256xf32, #tpu.memory_space<vmem>>, vector<1x256xf32>
    %96 = vector.broadcast %95 : vector<1x256xf32> to vector<8x256xf32>
    %97 = arith.mulf %94, %96 : vector<8x256xf32>
    %98 = arith.truncf %97 : vector<8x256xf32> to vector<8x256xbf16>
    %c24_58 = arith.constant 24 : index
    %c0_59 = arith.constant 0 : index
    %99 = vector.load %arg13[%c24_58, %c0_59] : memref<72x256xbf16, #tpu.memory_space<vmem>>, vector<8x256xbf16>
    tpu.vector_store %arg13[%c24_58, %c0_59], %98 {strides = array<i32>} : memref<72x256xbf16, #tpu.memory_space<vmem>>, vector<8x256xbf16>,
    %c4_60 = arith.constant 4 : index
    %c0_61 = arith.constant 0 : index
    %100 = vector.load %arg2[%c4_60, %c0_61] : memref<9x256xf32, #tpu.memory_space<vmem>>, vector<1x256xf32>
    %101 = vector.broadcast %100 : vector<1x256xf32> to vector<8x256xf32>
    %102 = arith.mulf %75, %101 : vector<8x256xf32>
    %103 = arith.truncf %102 : vector<8x256xf32> to vector<8x256xbf16>
    %c32_62 = arith.constant 32 : index
    %c0_63 = arith.constant 0 : index
    %104 = vector.load %arg13[%c32_62, %c0_63] : memref<72x256xbf16, #tpu.memory_space<vmem>>, vector<8x256xbf16>
    tpu.vector_store %arg13[%c32_62, %c0_63], %103 {strides = array<i32>} : memref<72x256xbf16, #tpu.memory_space<vmem>>, vector<8x256xbf16>,
    %c255_i32_64 = arith.constant 255 : i32
    %105 = tpu.dynamic_rotate %75 by %c255_i32_64 dim 1 : vector<8x256xf32>, i32 -> vector<8x256xf32>
    %c5_65 = arith.constant 5 : index
    %c0_66 = arith.constant 0 : index
    %106 = vector.load %arg2[%c5_65, %c0_66] : memref<9x256xf32, #tpu.memory_space<vmem>>, vector<1x256xf32>
    %107 = vector.broadcast %106 : vector<1x256xf32> to vector<8x256xf32>
    %108 = arith.mulf %105, %107 : vector<8x256xf32>
    %109 = arith.truncf %108 : vector<8x256xf32> to vector<8x256xbf16>
    %c40 = arith.constant 40 : index
    %c0_67 = arith.constant 0 : index
    %110 = vector.load %arg13[%c40, %c0_67] : memref<72x256xbf16, #tpu.memory_space<vmem>>, vector<8x256xbf16>
    tpu.vector_store %arg13[%c40, %c0_67], %109 {strides = array<i32>} : memref<72x256xbf16, #tpu.memory_space<vmem>>, vector<8x256xbf16>,
    %c241_i32_68 = arith.constant 241 : i32
    %111 = tpu.dynamic_rotate %75 by %c241_i32_68 dim 1 : vector<8x256xf32>, i32 -> vector<8x256xf32>
    %c6_69 = arith.constant 6 : index
    %c0_70 = arith.constant 0 : index
    %112 = vector.load %arg2[%c6_69, %c0_70] : memref<9x256xf32, #tpu.memory_space<vmem>>, vector<1x256xf32>
    %113 = vector.broadcast %112 : vector<1x256xf32> to vector<8x256xf32>
    %114 = arith.mulf %111, %113 : vector<8x256xf32>
    %115 = arith.truncf %114 : vector<8x256xf32> to vector<8x256xbf16>
    %c48 = arith.constant 48 : index
    %c0_71 = arith.constant 0 : index
    %116 = vector.load %arg13[%c48, %c0_71] : memref<72x256xbf16, #tpu.memory_space<vmem>>, vector<8x256xbf16>
    tpu.vector_store %arg13[%c48, %c0_71], %115 {strides = array<i32>} : memref<72x256xbf16, #tpu.memory_space<vmem>>, vector<8x256xbf16>,
    %c240_i32_72 = arith.constant 240 : i32
    %117 = tpu.dynamic_rotate %75 by %c240_i32_72 dim 1 : vector<8x256xf32>, i32 -> vector<8x256xf32>
    %c7_73 = arith.constant 7 : index
    %c0_74 = arith.constant 0 : index
    %118 = vector.load %arg2[%c7_73, %c0_74] : memref<9x256xf32, #tpu.memory_space<vmem>>, vector<1x256xf32>
    %119 = vector.broadcast %118 : vector<1x256xf32> to vector<8x256xf32>
    %120 = arith.mulf %117, %119 : vector<8x256xf32>
    %121 = arith.truncf %120 : vector<8x256xf32> to vector<8x256xbf16>
    %c56 = arith.constant 56 : index
    %c0_75 = arith.constant 0 : index
    %122 = vector.load %arg13[%c56, %c0_75] : memref<72x256xbf16, #tpu.memory_space<vmem>>, vector<8x256xbf16>
    tpu.vector_store %arg13[%c56, %c0_75], %121 {strides = array<i32>} : memref<72x256xbf16, #tpu.memory_space<vmem>>, vector<8x256xbf16>,
    %c239_i32_76 = arith.constant 239 : i32
    %123 = tpu.dynamic_rotate %75 by %c239_i32_76 dim 1 : vector<8x256xf32>, i32 -> vector<8x256xf32>
    %c8_77 = arith.constant 8 : index
    %c0_78 = arith.constant 0 : index
    %124 = vector.load %arg2[%c8_77, %c0_78] : memref<9x256xf32, #tpu.memory_space<vmem>>, vector<1x256xf32>
    %125 = vector.broadcast %124 : vector<1x256xf32> to vector<8x256xf32>
    %126 = arith.mulf %123, %125 : vector<8x256xf32>
    %127 = arith.truncf %126 : vector<8x256xf32> to vector<8x256xbf16>
    %c64 = arith.constant 64 : index
    %c0_79 = arith.constant 0 : index
    %128 = vector.load %arg13[%c64, %c0_79] : memref<72x256xbf16, #tpu.memory_space<vmem>>, vector<8x256xbf16>
    tpu.vector_store %arg13[%c64, %c0_79], %127 {strides = array<i32>} : memref<72x256xbf16, #tpu.memory_space<vmem>>, vector<8x256xbf16>,
    %c0_80 = arith.constant 0 : index
    %c0_81 = arith.constant 0 : index
    %129 = vector.load %arg5[%c0_80, %c0_81] : memref<8x72xbf16, #tpu.memory_space<vmem>>, vector<8x72xbf16>
    %c0_82 = arith.constant 0 : index
    %c0_83 = arith.constant 0 : index
    %130 = vector.load %arg13[%c0_82, %c0_83] : memref<72x256xbf16, #tpu.memory_space<vmem>>, vector<72x256xbf16>
    %cst_84 = arith.constant dense<0.000000e+00> : vector<8x256xf32>
    %131 = tpu.matmul %129, %130, %cst_84 {dimension_numbers = #tpu.dot_dimension_numbers<[1], [0], [0], [1], [0, 0, 1, 1], [], []>} : vector<8x72xbf16>, vector<72x256xbf16>, vector<8x256xf32> -> vector<8x256xf32>
    %c17_i32_85 = arith.constant 17 : i32
    %132 = tpu.dynamic_rotate %131 by %c17_i32_85 dim 1 : vector<8x256xf32>, i32 -> vector<8x256xf32>
    %c0_86 = arith.constant 0 : index
    %c0_87 = arith.constant 0 : index
    %133 = vector.load %arg2[%c0_86, %c0_87] : memref<9x256xf32, #tpu.memory_space<vmem>>, vector<1x256xf32>
    %134 = vector.broadcast %133 : vector<1x256xf32> to vector<8x256xf32>
    %135 = arith.mulf %132, %134 : vector<8x256xf32>
    %136 = arith.truncf %135 : vector<8x256xf32> to vector<8x256xbf16>
    %c0_88 = arith.constant 0 : index
    %c0_89 = arith.constant 0 : index
    %137 = vector.load %arg13[%c0_88, %c0_89] : memref<72x256xbf16, #tpu.memory_space<vmem>>, vector<8x256xbf16>
    tpu.vector_store %arg13[%c0_88, %c0_89], %136 {strides = array<i32>} : memref<72x256xbf16, #tpu.memory_space<vmem>>, vector<8x256xbf16>,
    %c16_i32_90 = arith.constant 16 : i32
    %138 = tpu.dynamic_rotate %131 by %c16_i32_90 dim 1 : vector<8x256xf32>, i32 -> vector<8x256xf32>
    %c1_91 = arith.constant 1 : index
    %c0_92 = arith.constant 0 : index
    %139 = vector.load %arg2[%c1_91, %c0_92] : memref<9x256xf32, #tpu.memory_space<vmem>>, vector<1x256xf32>
    %140 = vector.broadcast %139 : vector<1x256xf32> to vector<8x256xf32>
    %141 = arith.mulf %138, %140 : vector<8x256xf32>
    %142 = arith.truncf %141 : vector<8x256xf32> to vector<8x256xbf16>
    %c8_93 = arith.constant 8 : index
    %c0_94 = arith.constant 0 : index
    %143 = vector.load %arg13[%c8_93, %c0_94] : memref<72x256xbf16, #tpu.memory_space<vmem>>, vector<8x256xbf16>
    tpu.vector_store %arg13[%c8_93, %c0_94], %142 {strides = array<i32>} : memref<72x256xbf16, #tpu.memory_space<vmem>>, vector<8x256xbf16>,
    %c15_i32_95 = arith.constant 15 : i32
    %144 = tpu.dynamic_rotate %131 by %c15_i32_95 dim 1 : vector<8x256xf32>, i32 -> vector<8x256xf32>
    %c2_96 = arith.constant 2 : index
    %c0_97 = arith.constant 0 : index
    %145 = vector.load %arg2[%c2_96, %c0_97] : memref<9x256xf32, #tpu.memory_space<vmem>>, vector<1x256xf32>
    %146 = vector.broadcast %145 : vector<1x256xf32> to vector<8x256xf32>
    %147 = arith.mulf %144, %146 : vector<8x256xf32>
    %148 = arith.truncf %147 : vector<8x256xf32> to vector<8x256xbf16>
    %c16_98 = arith.constant 16 : index
    %c0_99 = arith.constant 0 : index
    %149 = vector.load %arg13[%c16_98, %c0_99] : memref<72x256xbf16, #tpu.memory_space<vmem>>, vector<8x256xbf16>
    tpu.vector_store %arg13[%c16_98, %c0_99], %148 {strides = array<i32>} : memref<72x256xbf16, #tpu.memory_space<vmem>>, vector<8x256xbf16>,
    %c1_i32_100 = arith.constant 1 : i32
    %150 = tpu.dynamic_rotate %131 by %c1_i32_100 dim 1 : vector<8x256xf32>, i32 -> vector<8x256xf32>
    %c3_101 = arith.constant 3 : index
    %c0_102 = arith.constant 0 : index
    %151 = vector.load %arg2[%c3_101, %c0_102] : memref<9x256xf32, #tpu.memory_space<vmem>>, vector<1x256xf32>
    %152 = vector.broadcast %151 : vector<1x256xf32> to vector<8x256xf32>
    %153 = arith.mulf %150, %152 : vector<8x256xf32>
    %154 = arith.truncf %153 : vector<8x256xf32> to vector<8x256xbf16>
    %c24_103 = arith.constant 24 : index
    %c0_104 = arith.constant 0 : index
    %155 = vector.load %arg13[%c24_103, %c0_104] : memref<72x256xbf16, #tpu.memory_space<vmem>>, vector<8x256xbf16>
    tpu.vector_store %arg13[%c24_103, %c0_104], %154 {strides = array<i32>} : memref<72x256xbf16, #tpu.memory_space<vmem>>, vector<8x256xbf16>,
    %c4_105 = arith.constant 4 : index
    %c0_106 = arith.constant 0 : index
    %156 = vector.load %arg2[%c4_105, %c0_106] : memref<9x256xf32, #tpu.memory_space<vmem>>, vector<1x256xf32>
    %157 = vector.broadcast %156 : vector<1x256xf32> to vector<8x256xf32>
    %158 = arith.mulf %131, %157 : vector<8x256xf32>
    %159 = arith.truncf %158 : vector<8x256xf32> to vector<8x256xbf16>
    %c32_107 = arith.constant 32 : index
    %c0_108 = arith.constant 0 : index
    %160 = vector.load %arg13[%c32_107, %c0_108] : memref<72x256xbf16, #tpu.memory_space<vmem>>, vector<8x256xbf16>
    tpu.vector_store %arg13[%c32_107, %c0_108], %159 {strides = array<i32>} : memref<72x256xbf16, #tpu.memory_space<vmem>>, vector<8x256xbf16>,
    %c255_i32_109 = arith.constant 255 : i32
    %161 = tpu.dynamic_rotate %131 by %c255_i32_109 dim 1 : vector<8x256xf32>, i32 -> vector<8x256xf32>
    %c5_110 = arith.constant 5 : index
    %c0_111 = arith.constant 0 : index
    %162 = vector.load %arg2[%c5_110, %c0_111] : memref<9x256xf32, #tpu.memory_space<vmem>>, vector<1x256xf32>
    %163 = vector.broadcast %162 : vector<1x256xf32> to vector<8x256xf32>
    %164 = arith.mulf %161, %163 : vector<8x256xf32>
    %165 = arith.truncf %164 : vector<8x256xf32> to vector<8x256xbf16>
    %c40_112 = arith.constant 40 : index
    %c0_113 = arith.constant 0 : index
    %166 = vector.load %arg13[%c40_112, %c0_113] : memref<72x256xbf16, #tpu.memory_space<vmem>>, vector<8x256xbf16>
    tpu.vector_store %arg13[%c40_112, %c0_113], %165 {strides = array<i32>} : memref<72x256xbf16, #tpu.memory_space<vmem>>, vector<8x256xbf16>,
    %c241_i32_114 = arith.constant 241 : i32
    %167 = tpu.dynamic_rotate %131 by %c241_i32_114 dim 1 : vector<8x256xf32>, i32 -> vector<8x256xf32>
    %c6_115 = arith.constant 6 : index
    %c0_116 = arith.constant 0 : index
    %168 = vector.load %arg2[%c6_115, %c0_116] : memref<9x256xf32, #tpu.memory_space<vmem>>, vector<1x256xf32>
    %169 = vector.broadcast %168 : vector<1x256xf32> to vector<8x256xf32>
    %170 = arith.mulf %167, %169 : vector<8x256xf32>
    %171 = arith.truncf %170 : vector<8x256xf32> to vector<8x256xbf16>
    %c48_117 = arith.constant 48 : index
    %c0_118 = arith.constant 0 : index
    %172 = vector.load %arg13[%c48_117, %c0_118] : memref<72x256xbf16, #tpu.memory_space<vmem>>, vector<8x256xbf16>
    tpu.vector_store %arg13[%c48_117, %c0_118], %171 {strides = array<i32>} : memref<72x256xbf16, #tpu.memory_space<vmem>>, vector<8x256xbf16>,
    %c240_i32_119 = arith.constant 240 : i32
    %173 = tpu.dynamic_rotate %131 by %c240_i32_119 dim 1 : vector<8x256xf32>, i32 -> vector<8x256xf32>
    %c7_120 = arith.constant 7 : index
    %c0_121 = arith.constant 0 : index
    %174 = vector.load %arg2[%c7_120, %c0_121] : memref<9x256xf32, #tpu.memory_space<vmem>>, vector<1x256xf32>
    %175 = vector.broadcast %174 : vector<1x256xf32> to vector<8x256xf32>
    %176 = arith.mulf %173, %175 : vector<8x256xf32>
    %177 = arith.truncf %176 : vector<8x256xf32> to vector<8x256xbf16>
    %c56_122 = arith.constant 56 : index
    %c0_123 = arith.constant 0 : index
    %178 = vector.load %arg13[%c56_122, %c0_123] : memref<72x256xbf16, #tpu.memory_space<vmem>>, vector<8x256xbf16>
    tpu.vector_store %arg13[%c56_122, %c0_123], %177 {strides = array<i32>} : memref<72x256xbf16, #tpu.memory_space<vmem>>, vector<8x256xbf16>,
    %c239_i32_124 = arith.constant 239 : i32
    %179 = tpu.dynamic_rotate %131 by %c239_i32_124 dim 1 : vector<8x256xf32>, i32 -> vector<8x256xf32>
    %c8_125 = arith.constant 8 : index
    %c0_126 = arith.constant 0 : index
    %180 = vector.load %arg2[%c8_125, %c0_126] : memref<9x256xf32, #tpu.memory_space<vmem>>, vector<1x256xf32>
    %181 = vector.broadcast %180 : vector<1x256xf32> to vector<8x256xf32>
    %182 = arith.mulf %179, %181 : vector<8x256xf32>
    %183 = arith.truncf %182 : vector<8x256xf32> to vector<8x256xbf16>
    %c64_127 = arith.constant 64 : index
    %c0_128 = arith.constant 0 : index
    %184 = vector.load %arg13[%c64_127, %c0_128] : memref<72x256xbf16, #tpu.memory_space<vmem>>, vector<8x256xbf16>
    tpu.vector_store %arg13[%c64_127, %c0_128], %183 {strides = array<i32>} : memref<72x256xbf16, #tpu.memory_space<vmem>>, vector<8x256xbf16>,
    %c0_129 = arith.constant 0 : index
    %c0_130 = arith.constant 0 : index
    %185 = vector.load %arg6[%c0_129, %c0_130] : memref<8x72xbf16, #tpu.memory_space<vmem>>, vector<8x72xbf16>
    %c0_131 = arith.constant 0 : index
    %c0_132 = arith.constant 0 : index
    %186 = vector.load %arg13[%c0_131, %c0_132] : memref<72x256xbf16, #tpu.memory_space<vmem>>, vector<72x256xbf16>
    %cst_133 = arith.constant dense<0.000000e+00> : vector<8x256xf32>
    %187 = tpu.matmul %185, %186, %cst_133 {dimension_numbers = #tpu.dot_dimension_numbers<[1], [0], [0], [1], [0, 0, 1, 1], [], []>} : vector<8x72xbf16>, vector<72x256xbf16>, vector<8x256xf32> -> vector<8x256xf32>
    %c0_134 = arith.constant 0 : index
    %c0_135 = arith.constant 0 : index
    %188 = vector.load %arg10[%c0_134, %c0_135] : memref<8x2xf32, #tpu.memory_space<vmem>>, vector<8x1xf32>
    %189 = vector.broadcast %188 : vector<8x1xf32> to vector<8x256xf32>
    %190 = arith.mulf %187, %189 : vector<8x256xf32>
    %c0_136 = arith.constant 0 : index
    %c1_137 = arith.constant 1 : index
    %191 = vector.load %arg10[%c0_136, %c1_137] : memref<8x2xf32, #tpu.memory_space<vmem>>, vector<8x1xf32>
    %192 = vector.broadcast %191 : vector<8x1xf32> to vector<8x256xf32>
    %193 = arith.addf %190, %192 : vector<8x256xf32>
    %c0_138 = arith.constant 0 : index
    %c0_139 = arith.constant 0 : index
    %194 = vector.load %arg7[%c0_138, %c0_139] : memref<8x4xf32, #tpu.memory_space<vmem>>, vector<8x4xf32>
    %cst_140 = arith.constant dense<0.000000e+00> : vector<8x256xf32>
    %195 = tpu.matmul %194, %1, %cst_140 {dimension_numbers = #tpu.dot_dimension_numbers<[1], [0], [0], [1], [0, 0, 1, 1], [], []>} : vector<8x4xf32>, vector<4x256xf32>, vector<8x256xf32> -> vector<8x256xf32>
    %c0_141 = arith.constant 0 : index
    %c0_142 = arith.constant 0 : index
    %196 = vector.load %arg11[%c0_141, %c0_142] : memref<8x2xf32, #tpu.memory_space<vmem>>, vector<8x1xf32>
    %197 = vector.broadcast %196 : vector<8x1xf32> to vector<8x256xf32>
    %198 = arith.mulf %195, %197 : vector<8x256xf32>
    %c0_143 = arith.constant 0 : index
    %c1_144 = arith.constant 1 : index
    %199 = vector.load %arg11[%c0_143, %c1_144] : memref<8x2xf32, #tpu.memory_space<vmem>>, vector<8x1xf32>
    %200 = vector.broadcast %199 : vector<8x1xf32> to vector<8x256xf32>
    %201 = arith.addf %198, %200 : vector<8x256xf32>
    %202 = arith.addf %193, %201 : vector<8x256xf32>
    %cst_145 = arith.constant 0.000000e+00 : f32
    %203 = vector.broadcast %cst_145 : f32 to vector<8x256xf32>
    %204 = arith.cmpf oge, %202, %203 : vector<8x256xf32>
    %cst_146 = arith.constant 1.000000e-01 : f32
    %205 = vector.broadcast %cst_146 : f32 to vector<8x256xf32>
    %206 = arith.mulf %205, %202 : vector<8x256xf32>
    %207 = arith.select %204, %202, %206 : vector<8x256xi1>, vector<8x256xf32>
    %c255_i32_147 = arith.constant 255 : i32
    %208 = tpu.dynamic_rotate %207 by %c255_i32_147 dim 1 : vector<8x256xf32>, i32 -> vector<8x256xf32>
    %209 = arith.maximumf %207, %208 : vector<8x256xf32>
    %c240_i32_148 = arith.constant 240 : i32
    %210 = tpu.dynamic_rotate %209 by %c240_i32_148 dim 1 : vector<8x256xf32>, i32 -> vector<8x256xf32>
    %211 = arith.maximumf %209, %210 : vector<8x256xf32>
    %c0_149 = arith.constant 0 : index
    %c0_150 = arith.constant 0 : index
    %212 = vector.load %arg3[%c0_149, %c0_150] : memref<256x128xf32, #tpu.memory_space<vmem>>, vector<256x128xf32>
    %cst_151 = arith.constant dense<0.000000e+00> : vector<8x128xf32>
    %213 = tpu.matmul %211, %212, %cst_151 {dimension_numbers = #tpu.dot_dimension_numbers<[1], [0], [0], [1], [0, 0, 1, 1], [], []>} : vector<8x256xf32>, vector<256x128xf32>, vector<8x128xf32> -> vector<8x128xf32>
    %c0_152 = arith.constant 0 : index
    %c0_153 = arith.constant 0 : index
    %c0_154 = arith.constant 0 : index
    %214 = vector.load %arg12[%c0_152, %c0_153, %c0_154] : memref<1x8x128xf32, #tpu.memory_space<vmem>>, vector<1x8x128xf32>
    %215 = vector.shape_cast %214 : vector<1x8x128xf32> to vector<8x128xf32>
    %216 = vector.shape_cast %213 : vector<8x128xf32> to vector<1x8x128xf32>
    tpu.vector_store %arg12[%c0_152, %c0_153, %c0_154], %216 {strides = array<i32>} : memref<1x8x128xf32, #tpu.memory_space<vmem>>, vector<1x8x128xf32>,
    return
  }
  func.func @transform_0(%arg0: i32) -> (i32, i32, i32) {
    %c0_i32 = arith.constant 0 : i32
    %c0_i32_0 = arith.constant 0 : i32
    %c0_i32_1 = arith.constant 0 : i32
    return %arg0, %c0_i32, %c0_i32_0 : i32, i32, i32
  }
  func.func @transform_1(%arg0: i32) -> (i32, i32) {
    %c0_i32 = arith.constant 0 : i32
    %c0_i32_0 = arith.constant 0 : i32
    %c0_i32_1 = arith.constant 0 : i32
    return %c0_i32, %c0_i32_0 : i32, i32
  }
  func.func @transform_2(%arg0: i32) -> (i32, i32) {
    %c0_i32 = arith.constant 0 : i32
    %c0_i32_0 = arith.constant 0 : i32
    %c0_i32_1 = arith.constant 0 : i32
    return %c0_i32, %c0_i32_0 : i32, i32
  }
  func.func @transform_3(%arg0: i32) -> (i32, i32) {
    %c0_i32 = arith.constant 0 : i32
    %c0_i32_0 = arith.constant 0 : i32
    %c0_i32_1 = arith.constant 0 : i32
    return %c0_i32, %c0_i32_0 : i32, i32
  }
  func.func @transform_4(%arg0: i32) -> (i32, i32) {
    %c0_i32 = arith.constant 0 : i32
    %c0_i32_0 = arith.constant 0 : i32
    %c0_i32_1 = arith.constant 0 : i32
    return %c0_i32, %c0_i32_0 : i32, i32
  }
  func.func @transform_5(%arg0: i32) -> (i32, i32) {
    %c0_i32 = arith.constant 0 : i32
    %c0_i32_0 = arith.constant 0 : i32
    %c0_i32_1 = arith.constant 0 : i32
    return %c0_i32, %c0_i32_0 : i32, i32
  }
  func.func @transform_6(%arg0: i32) -> (i32, i32) {
    %c0_i32 = arith.constant 0 : i32
    %c0_i32_0 = arith.constant 0 : i32
    %c0_i32_1 = arith.constant 0 : i32
    return %c0_i32, %c0_i32_0 : i32, i32
  }
  func.func @transform_7(%arg0: i32) -> (i32, i32) {
    %c0_i32 = arith.constant 0 : i32
    %c0_i32_0 = arith.constant 0 : i32
    %c0_i32_1 = arith.constant 0 : i32
    return %c0_i32, %c0_i32_0 : i32, i32
  }
  func.func @transform_8(%arg0: i32) -> (i32, i32) {
    %c0_i32 = arith.constant 0 : i32
    %c0_i32_0 = arith.constant 0 : i32
    %c0_i32_1 = arith.constant 0 : i32
    return %c0_i32, %c0_i32_0 : i32, i32
  }
  func.func @transform_9(%arg0: i32) -> (i32, i32) {
    %c0_i32 = arith.constant 0 : i32
    %c0_i32_0 = arith.constant 0 : i32
    %c0_i32_1 = arith.constant 0 : i32
    return %c0_i32, %c0_i32_0 : i32, i32
  }
  func.func @transform_10(%arg0: i32) -> (i32, i32) {
    %c0_i32 = arith.constant 0 : i32
    %c0_i32_0 = arith.constant 0 : i32
    %c0_i32_1 = arith.constant 0 : i32
    return %c0_i32, %c0_i32_0 : i32, i32
  }
  func.func @transform_11(%arg0: i32) -> (i32, i32, i32) {
    %c0_i32 = arith.constant 0 : i32
    %c0_i32_0 = arith.constant 0 : i32
    %c0_i32_1 = arith.constant 0 : i32
    return %arg0, %c0_i32, %c0_i32_0 : i32, i32, i32
  }
}

</mosaic_0001>

<bundles_post_ra>
// kernel: block_forward.1
= control target key start
LH: loop header
LB: loop body
LE: loop exit
PB: predicated region body
PF: predicated region fallthrough
CT: control target
= control target key end

     0   :  { %16 = vsyncpa [#allocation4], 0  ;;  %s2276_s17 = smov 0   ;;  %s2718_s0 = inlined_call_operand.vmem [shape: f32[2,4,256], index: 0, kind: input, shape index: {}]   ;;  %s2719_s1 = inlined_call_operand.hbm [shape: f32[9,256], index: 1, kind: input, shape index: {}]   ;;  %s2720_s2 = inlined_call_operand.vmem [shape: f32[256,128], index: 2, kind: input, shape index: {}]   ;;  %s2721_s3 = inlined_call_operand.vmem [shape: bf16[8,36], index: 3, kind: input, shape index: {}]   ;;  %s2722_s4 = inlined_call_operand.vmem [shape: bf16[8,72], index: 4, kind: input, shape index: {}]   ;;  %s2723_s5 = inlined_call_operand.vmem [shape: bf16[8,72], index: 5, kind: input, shape index: {}]   ;;  %s2724_s6 = inlined_call_operand.vmem [shape: f32[8,4], index: 6, kind: input, shape index: {}]   ;;  %s2725_s7 = inlined_call_operand.vmem [shape: f32[4,2], index: 7, kind: input, shape index: {}]   ;;  %s2726_s8 = inlined_call_operand.vmem [shape: f32[8,2], index: 8, kind: input, shape index: {}]   ;;  %s2727_s9 = inlined_call_operand.vmem [shape: f32[8,2], index: 9, kind: input, shape index: {}]   ;;  %s2728_s10 = inlined_call_operand.vmem [shape: f32[8,2], index: 10, kind: input, shape index: {}]   ;;  %s2729_s11 = inlined_call_operand.vmem [shape: f32[2,8,128], index: 11, kind: output, shape index: {}]  }
   0x1 LB: > { %s2282_s18 = sadd.s32 4294967295, %s2199_s17   ;;  %p1836_p0 = scmp.ge.s32.totalorder %s2199_s17, 1  ;;  %s2199_s17 = sphi %s2276_s17, %s22_s17  }
   0x2   : > { %p289_p1 = scmp.lt.s32.totalorder %s2199_s17, 3  ;;  %s2201_s19 = smov [#allocation3]  }
   0x3   : > { %s301_s20 = sshll.u32 %s2201_s19, 4  ;;  %p2730_p3 = scmp.eq.s32.totalorder %s2282_s18, 0  ;;  %s302_s20 = int_to_ptr.vmem [resolvable:$true] %s301_s20 }
   0x4   : > { %p2286_p2 = pnand %p1836_p0, %p289_p1  ;;  %s2161_s25 = scalar_lea.hbm %s2719_s1, 512 }
   0x5   : > { %p2162_p6 = scmp.ne.s32.totalorder %s2719_s1, %s2161_s25  ;;  %p2168_p10 = scmp.lt.u32.totalorder %s2161_s25, %s2719_s1 }
   0x6   : > { %s2732_s21 = scalar_select %p2286_p2, 1, 0 }
   0x7   : > { %p2007_p4 = pneg %p2286_p2 }
   0x9   : > { %p2295_p5 = pnand %p2730_p3, %p2007_p4 }
   0xb   : > { %p2163_p7 = pneg %p2295_p5 }
   0xd   : > { %p2164_p8 = pnand %p2163_p7, %p2162_p6 }
   0xf   : > { %p2165_p9 = pneg %p2164_p8 }
  0x11   : > { %p2170_p11 = pnand %p2168_p10, %p2165_p9 }
  0x13   : > { %2173 = shalt.err (!%p2170_p11)
}
  0x14   : > { %s2174_s30 = scalar_lea.vmem %s302_s20, 512  ;;  %p2182_p1 = scmp.lt.s32.totalorder %s302_s20, %s302_s20 }
  0x15   : > { %p2175_p12 = scmp.ne.s32.totalorder %s302_s20, %s2174_s30  ;;  %p2183_p4 = scmp.lt.s32.totalorder %s2174_s30, %s2174_s30 }
  0x17   : > { %p2177_p13 = pnand %p2175_p12, %p2163_p7  ;;  %p2184_p3 = por %p2183_p4, %p2182_p1 }
  0x19   : > { %p2178_p0 = pneg %p2177_p13 }
  0x1b   : > { %p2185_p2 = pnand %p2184_p3, %p2178_p0 }
  0x1d   : > { %2188 = shalt.err (!%p2185_p2)
}
  0x1e   : > { %s2202_s12 = smov 256   ;;  %s2203_s13 = smov 16  }
  0x1f   : > { %2010 = dma.hbm_to_vmem [thread:$0]  (!%p2295_p5), %s2719_s1, 512, %s302_s20, [#allocation4], %s2202_s12, %s2202_s12, %s2203_s13  }
  0x20   : > { %p2734_p6 = scmp.ne.s32.totalorder %s2732_s21, 0 }
  0x21   : > { %p2735_p8 = scmp.eq.s32.totalorder (!%p2734_p6), %s2282_s18, 0 }
  0x22   : > { %352 = sbr.rel (%p2734_p6) target bundleno = 1757 (0x6dd), region = 64 }
  0x29   : > { %2194 = dma.done.wait (%p2735_p8), [#allocation4], 512   ;;  %p2736_p7 = pmov %p2735_p8 }
  0x2a   : > { %v2204_v0 = vmov 0   ;;  %v402_v1 = vld [vmem:[%s2725_s7] sm:$0xf]  ;;  %v2205_v2 = vmov 1   ;;  %p391_p2 = scmp.lt.s32.totalorder %s2282_s18, 1  ;;  %v410_v5 = vlaneseq  ;;  %v2207_v21 = vmov 0.0  }
  0x2b   : > { %2196 = vsyncadd (%p2736_p7), [#allocation4], 4294966784  ;;  %2036 = vset.pattern.permute.xlu0 %v2204_v0  ;;  %785 = vmatprep.mubr.bf16.mxu0 %v2204_v0  ;;  %v2206_v3 = vmov 839922192   ;;  %s2208_s24 = smov 15   ;;  %s2209_s25 = smov 16  }
  0x2c   : > { %2078 = vset.pattern.permute.xlu1 %v2204_v0  ;;  %1163 = vmatprep.mubr.bf16.mxu1 %v2204_v0  ;;  %v408_v4 = vunpack.c.l.s4 %v2206_v3  ;;  %s2738_s18 = smov (!%p391_p2, %s2282_s18), 1  ;;  %v411_v7 = vshrl.u32 %v410_v5, 7  ;;  %v560_v11 = vld [vmem:[#allocation3 + $0x4] ss:$8 sm:$0x3]  ;;  %s2210_s26 = smov 112  }
  0x2d   : > { %405 = vperm.xlu0 %2036, %v402_v1   ;;  %s1908_s20 = sshll.u32 %s2738_s18, 3  ;;  %s2211_s27 = smov 1   ;;  %v794_v28 = vld [vmem:[%s2726_s8] sm:$0xff]  ;;  %v2361_v29 = vand.u32 127, %v410_v5  ;;  %vm746_vm9 = vcmask 1041408   ;;  %vm742_vm10 = vcmask 293888  }
  0x2e   : > { %v409_v6 = vunpack.c.0.s8 %v408_v4  ;;  %v2334_v9 = vsub.s32 0, %v411_v7  ;;  %v2336_v10 = vsub.s32 1, %v411_v7  ;;  %s395_s23 = scalar_lea.vmem %s2718_s0, %s1908_s20  ;;  %s2212_s28 = smov 111   ;;  %v504_v30 = vld [vmem:[#allocation3 + $0x2] ss:$8 sm:$0x3] }
  0x2f   : > { %v2345_v16 = vld [vmem:[%s395_s23] sm:$0xff]  ;;  %s2213_s29 = smov 17   ;;  %s2214_s13 = smov 127   ;;  %v472_v31 = vld [vmem:[#allocation3 + $0x1] ss:$8 sm:$0x3] }
  0x30   : > { %v412_v8 = vsub.s32 %v409_v6, %v411_v7  ;;  %v565_v14 = vrot.slane %v560_v11, %v2334_v9  ;;  %v569_v15 = vrot.slane %v560_v11, %v2336_v10  ;;  %s2215_s14 = smov 113   ;;  %v656_v32 = vld [vmem:[#allocation3 + $0x7] ss:$8 sm:$0x3]  ;;  %vm500_vm1 = vcmp.lt.s32.totalorder %v2361_v29, 15  ;;  %s399_s23 = scalar_lea.vmem %s2729_s11, %s1908_s20 }
  0x31   : > { %2037 = vset.pattern.permute.xlu0 %v2205_v2  ;;  %v535_v33 = vld [vmem:[#allocation3 + $0x3] ss:$8 sm:$0x3]  ;;  %v509_v34 = vrot.slane %v504_v30, %v2334_v9  ;;  %v513_v35 = vrot.slane %v504_v30, %v2336_v10  ;;  %vm468_vm2 = vcmp.lt.s32.totalorder %v2361_v29, 16  ;;  %v477_v36 = vrot.slane %v472_v31, %v2334_v9 }
  0x32   : > { %417 = vperm.xlu0 %2037, %v402_v1   ;;  %v570_v19 = vcombine.low %v565_v14, %v569_v15  ;;  %v481_v37 = vrot.slane %v472_v31, %v2336_v10  ;;  %vm652_vm3 = vcmp.lt.s32.totalorder %v2361_v29, 112  ;;  %v661_v38 = vrot.slane %v656_v32, %v2334_v9  ;;  %v688_v39 = vld [vmem:[#allocation3 + $0x10] ss:$8 sm:$0x3] }
  0x33   : > { %v665_v42 = vrot.slane %v656_v32, %v2336_v10  ;;  %vm531_vm4 = vcmp.lt.s32.totalorder %v2361_v29, 1  ;;  %v540_v43 = vrot.slane %v535_v33, %v2334_v9  ;;  %v544_v44 = vrot.slane %v535_v33, %v2336_v10  ;;  %v441_v55 = vld [vmem:[#allocation3] ss:$8 sm:$0x3] }
  0x34   : > { %vm684_vm5 = vcmp.lt.s32.totalorder %v2361_v29, 111  ;;  %v693_v49 = vrot.slane %v688_v39, %v2334_v9  ;;  %v697_v50 = vrot.slane %v688_v39, %v2336_v10  ;;  %vm438_vm6 = vcmp.lt.s32.totalorder %v2361_v29, 17  ;;  %v593_v14 = vld [vmem:[#allocation3 + $0x5] ss:$8 sm:$0x3] }
  0x35   : > { %v446_v6 = vrot.slane %v441_v55, %v2334_v9  ;;  %v450_v7 = vrot.slane %v441_v55, %v2336_v10  ;;  %vm589_vm7 = vcmp.lt.s32.totalorder %v2361_v29, 127  ;;  %v598_v30 = vrot.slane %v593_v14, %v2334_v9 }
  0x36   : > { %vm621_vm8 = vcmp.lt.s32.totalorder %v2361_v29, 113  ;;  %vm1124_vm13 = vcmask 1043456   ;;  %vm1120_vm14 = vcmask 588800   ;;  %vm1549_vm15 = vcmask 31744  }
  0xac   : > { %v406_v12 = vpop.permute.xlu0 %405 }
  0xad   : > { %v413_v13 = vrot.slane %v406_v12, %v412_v8 }
  0xaf   : > { %v415_v18 = vmul.f32 %v413_v13, %v2345_v16 }
  0xb1   : > { %v418_v17 = vpop.permute.xlu0 %417 }
  0xb2   : > { %v425_v20 = vrot.slane %v418_v17, %v412_v8 }
  0xb4   : > { %vm427_vm0 = vcmp.ge.f32.partialorder %v415_v18, %v425_v20 }
  0xb5   : > { %v428_v22 = vsel %vm427_vm0, 1.0, %v2207_v21 }
  0xb6   : > { %v430_v23 = vcombine.high %v428_v22, %v428_v22  ;;  %v572_v24 = vmul.f32 %v570_v19, %v428_v22 }
  0xb8   : > { %v574_v25 = vcombine.high %v572_v24, %v572_v24  ;;  %v2053_v26 = vpack.i.bf16 %v430_v23, %v428_v22 }
  0xba   : > { %v1913_v27 = vpack.c.bf16 %v574_v25, %v572_v24  ;;  %2054 = vrot.lane.b32.xlu0 %v2053_v26, %s2208_s24  ;;  %2039 = vrot.lane.b32.xlu1 %v2053_v26, %s2209_s25 }
  0xbc   : > { %584 = vst [vmem:[#allocation2 + $0x10] sm:$0x33] %v1913_v27 }
  0xbe   : > { %2064 = vrot.lane.b32.xlu0 %v2053_v26, %s2210_s26  ;;  %2044 = vrot.lane.b32.xlu1 %v2053_v26, %s2211_s27 }
  0xc2   : > { %2074 = vrot.lane.b32.xlu0 %v2053_v26, %s2212_s28  ;;  %2049 = vrot.lane.b32.xlu1 %v2053_v26, %s2213_s29 }
  0xc6   : > { %803 = vperm.xlu0 %2037, %v794_v28   ;;  %2059 = vrot.lane.b32.xlu1 %v2053_v26, %s2214_s13 }
  0xca   : > { %2069 = vrot.lane.b32.xlu1 %v2053_v26, %s2215_s14  ;;  %2119 = vset.pattern.permute.xlu0 %v2204_v0 }
  0xce   : > { %797 = vperm.xlu1 %2078, %v794_v28  }
 0x12c   : > { %v2055_v40 = vpop.permute.xlu0 %2054  ;;  %v2040_v41 = vpop.permute.xlu1 %2039 }
 0x12d   : > { %v2057_v45 = vunpack.i.h.bf16 %v2055_v40  ;;  %v2056_v46 = vunpack.i.l.bf16 %v2055_v40  ;;  %v2042_v47 = vunpack.i.h.bf16 %v2040_v41  ;;  %v2041_v48 = vunpack.i.l.bf16 %v2040_v41  ;;  %v625_v40 = vld [vmem:[#allocation3 + $0x6] ss:$8 sm:$0x3] }
 0x12f   : > { %v501_v51 = vsel %vm500_vm1, %v2056_v46, %v2057_v45  ;;  %v502_v52 = vsel %vm500_vm1, %v2057_v45, %v2056_v46  ;;  %v469_v53 = vsel %vm468_vm2, %v2041_v48, %v2042_v47  ;;  %v470_v54 = vsel %vm468_vm2, %v2042_v47, %v2041_v48 }
 0x130   : > { %v516_v56 = vmul.f32 %v509_v34, %v502_v52  ;;  %v517_v57 = vmul.f32 %v513_v35, %v501_v51  ;;  %v484_v58 = vmul.f32 %v477_v36, %v470_v54  ;;  %v485_v59 = vmul.f32 %v481_v37, %v469_v53  ;;  %v2065_v60 = vpop.permute.xlu0 %2064  ;;  %v2045_v61 = vpop.permute.xlu1 %2044 }
 0x131   : > { %v2067_v62 = vunpack.i.h.bf16 %v2065_v60  ;;  %v2066_v63 = vunpack.i.l.bf16 %v2065_v60  ;;  %v2047_v1 = vunpack.i.h.bf16 %v2045_v61  ;;  %v2046_v3 = vunpack.i.l.bf16 %v2045_v61 }
 0x132   : > { %v1911_v4 = vpack.c.bf16 %v517_v57, %v516_v56  ;;  %v1910_v5 = vpack.c.bf16 %v485_v59, %v484_v58  ;;  %v602_v34 = vrot.slane %v593_v14, %v2336_v10  ;;  %v630_v48 = vrot.slane %v625_v40, %v2334_v9 }
 0x133   : > { %v653_v8 = vsel %vm652_vm3, %v2066_v63, %v2067_v62  ;;  %v654_v11 = vsel %vm652_vm3, %v2067_v62, %v2066_v63  ;;  %v532_v12 = vsel %vm531_vm4, %v2046_v3, %v2047_v1  ;;  %v533_v13 = vsel %vm531_vm4, %v2047_v1, %v2046_v3 }
 0x134   : > { %526 = vst [vmem:[#allocation2 + $0x8] sm:$0x33] %v1911_v4  ;;  %v493_v15 = vrot.slane %v1910_v5, 6  ;;  %v668_v17 = vmul.f32 %v661_v38, %v653_v8  ;;  %v669_v18 = vmul.f32 %v665_v42, %v654_v11  ;;  %v547_v19 = vmul.f32 %v540_v43, %v533_v13  ;;  %v2075_v20 = vpop.permute.xlu0 %2074  ;;  %v2050_v22 = vpop.permute.xlu1 %2049  ;;  %v711_v13 = vld [vmem:[%s2721_s3] sm:$0xf] }
 0x135   : > { %v548_v23 = vmul.f32 %v544_v44, %v532_v12  ;;  %v2077_v24 = vunpack.i.h.bf16 %v2075_v20  ;;  %v2076_v25 = vunpack.i.l.bf16 %v2075_v20  ;;  %v2052_v26 = vunpack.i.h.bf16 %v2050_v22 }
 0x136   : > { %495 = vst [vmem:[#allocation2] sm:$0xcc] %v493_v15  ;;  %v1916_v27 = vpack.c.bf16 %v669_v18, %v668_v17  ;;  %v2051_v28 = vunpack.i.l.bf16 %v2050_v22  ;;  %v634_v52 = vrot.slane %v625_v40, %v2336_v10  ;;  %v926_v15 = vld [vmem:[#allocation3 + $0x4] ss:$8 sm:$0x3] }
 0x137   : > { %v1912_v31 = vpack.c.bf16 %v548_v23, %v547_v19  ;;  %v685_v32 = vsel %vm684_vm5, %v2076_v25, %v2077_v24  ;;  %v686_v33 = vsel %vm684_vm5, %v2077_v24, %v2076_v25  ;;  %v931_v19 = vrot.slane %v926_v15, %v2334_v9 }
 0x138   : > { %v677_v35 = vrot.slane %v1916_v27, 6  ;;  %v700_v36 = vmul.f32 %v693_v49, %v685_v32  ;;  %v701_v37 = vmul.f32 %v697_v50, %v686_v33  ;;  %v439_v38 = vsel %vm438_vm6, %v2051_v28, %v2052_v26  ;;  %v2060_v39 = vpop.permute.xlu1 %2059  ;;  %v845_v32 = vld [vmem:[#allocation3 + $0x1] ss:$8 sm:$0x3] }
 0x139   : > { %v556_v41 = vrot.slane %v1912_v31, 6  ;;  %v440_v42 = vsel %vm438_vm6, %v2052_v26, %v2051_v28  ;;  %v454_v43 = vmul.f32 %v450_v7, %v439_v38  ;;  %v2062_v44 = vunpack.i.h.bf16 %v2060_v39  ;;  %v816_v33 = vld [vmem:[#allocation3] ss:$8 sm:$0x3] }
 0x13a   : > { %679 = vst [vmem:[#allocation2 + $0x18] sm:$0xcc] %v677_v35  ;;  %v1917_v45 = vpack.c.bf16 %v701_v37, %v700_v36  ;;  %v453_v46 = vmul.f32 %v446_v6, %v440_v42  ;;  %v2061_v47 = vunpack.i.l.bf16 %v2060_v39  ;;  %v935_v24 = vrot.slane %v926_v15, %v2336_v10  ;;  %v874_v35 = vld [vmem:[#allocation3 + $0x2] ss:$8 sm:$0x3] }
 0x13b   : > { %558 = vst [vmem:[#allocation2 + $0x8] sm:$0xcc] %v556_v41  ;;  %v2439_v36 = vld [vmem:[#allocation3 + $0x6] ss:$8 sm:$0x3]  ;;  %v850_v37 = vrot.slane %v845_v32, %v2334_v9  ;;  %v854_v38 = vrot.slane %v845_v32, %v2336_v10  ;;  %v821_v39 = vrot.slane %v816_v33, %v2334_v9  ;;  %v825_v40 = vrot.slane %v816_v33, %v2336_v10 }
 0x13c   : > { %710 = vst [vmem:[#allocation2 + $0x20] sm:$0x33] %v1917_v45  ;;  %v1909_v49 = vpack.c.bf16 %v454_v43, %v453_v46  ;;  %v590_v50 = vsel %vm589_vm7, %v2061_v47, %v2062_v44  ;;  %v591_v51 = vsel %vm589_vm7, %v2062_v44, %v2061_v47  ;;  %v2070_v53 = vpop.permute.xlu1 %2069  ;;  %v955_v42 = vld [vmem:[#allocation3 + $0x5] ss:$8 sm:$0x3]  ;;  %v879_v47 = vrot.slane %v874_v35, %v2334_v9 }
 0x13d   : > { %v605_v54 = vmul.f32 %v598_v30, %v590_v50  ;;  %v606_v55 = vmul.f32 %v602_v34, %v591_v51  ;;  %v2072_v56 = vunpack.i.h.bf16 %v2070_v53  ;;  %v2071_v57 = vunpack.i.l.bf16 %v2070_v53  ;;  %v903_v34 = vld [vmem:[#allocation3 + $0x3] ss:$8 sm:$0x3]  ;;  %v2446_v43 = vld [vmem:[#allocation3 + $0x10] ss:$8 sm:$0x3] }
 0x13e   : > { %463 = vst [vmem:[#allocation2] sm:$0x33] %v1909_v49  ;;  %v908_v41 = vrot.slane %v903_v34, %v2334_v9  ;;  %v912_v46 = vrot.slane %v903_v34, %v2336_v10  ;;  %v989_v49 = vrot.slane %v2439_v36, %v2334_v9 }
 0x13f   : > { %v1914_v58 = vpack.c.bf16 %v606_v55, %v605_v54  ;;  %v622_v59 = vsel %vm621_vm8, %v2071_v57, %v2072_v56  ;;  %v623_v60 = vsel %vm621_vm8, %v2072_v56, %v2071_v57  ;;  %v993_v54 = vrot.slane %v2439_v36, %v2336_v10 }
 0x140   : > { %v637_v61 = vmul.f32 %v630_v48, %v622_v59  ;;  %v638_v62 = vmul.f32 %v634_v52, %v623_v60  ;;  %v883_v48 = vrot.slane %v874_v35, %v2336_v10  ;;  %v960_v55 = vrot.slane %v955_v42, %v2334_v9 }
 0x141   : > { %v614_v63 = vrot.slane %v1914_v58, 6  ;;  %v964_v56 = vrot.slane %v955_v42, %v2336_v10  ;;  %v1047_v57 = vrot.slane %v2446_v43, %v2334_v9 }
 0x142   : > { %v1915_v1 = vpack.c.bf16 %v638_v62, %v637_v61  ;;  %v1013_v62 = vld [vmem:[#allocation3 + $0x7] ss:$8 sm:$0x3] }
 0x143   : > { %616 = vst [vmem:[#allocation2 + $0x10] sm:$0xcc] %v614_v63  ;;  %v716_v5 = vld [vmem:[#allocation2 + $0x20] sm:$0x33] }
 0x144   : > { %647 = vst [vmem:[#allocation2 + $0x18] sm:$0x33] %v1915_v1  ;;  %v1858_v8 = vcombine.high %v716_v5, %v716_v5  ;;  %v1857_v11 = vcombine.low %v716_v5, %v716_v5 }
 0x145   : > { %v2133_v3 = vld [vmem:[#allocation2 + $0x4] ss:$8 sps:$4 sm:$0xff]   ;;  %v2135_v4 = vld [vmem:[#allocation2] ss:$8 sps:$4 sm:$0xff]   ;;  %v804_v22 = vpop.permute.xlu0 %803 }
 0x146   : > { %753 = vmatprep.subr.bf16.mxu0 %v2133_v3  ;;  %v748_v12 = vsel %vm746_vm9, %v1857_v11, 0 }
 0x147   : > { %754 = vmatpush1.bf16.msra.mxu0 %v2135_v4 }
 0x14b   : > { %v2136_v6 = vld [vmem:[#allocation2 + $0x14] ss:$8 sps:$4 sm:$0xff]   ;;  %v2138_v7 = vld [vmem:[#allocation2 + $0x10] ss:$8 sps:$4 sm:$0xff]  }
 0x14c   : > { %755 = vmatprep.subr.bf16.mxu0 %v2136_v6 }
 0x14d   : > { %756 = vmatpush1.bf16.msra.mxu0 %v2138_v7  ;;  %v798_v14 = vpop.permute.xlu1 %797 }
 0x14e   : > { %1859 = vmatprep.subr.msk.bf16.mxu0 %vm746_vm9, %v1858_v8 }
 0x151   : > { %758 = vmatpush1.bf16.msra.mxu0 %v748_v12 }
 0x154   : > { %1860 = vmatmul.mubr.msk.bf16.vlgmr.msra.gmra.mrb[0].mxu0 %vm742_vm10, %v711_v13  ;;  %v1051_v13 = vrot.slane %v2446_v43, %v2336_v10  ;;  %v1022_v43 = vrot.slane %v1013_v62, %v2336_v10 }
 0x155   : > { %1523 = vmatprep.mubr.bf16.mxu0 %v2204_v0 }
 0x227   : > { %v787_v17 = vpop.f32.mrb[0].mxu0 }
 0x228   : > { %v800_v18 = vmul.f32 %v798_v14, %v787_v17  ;;  %v789_v20 = vpop.f32.mrb[1].mxu0 }
 0x229   : > { %v801_v23 = vmul.f32 %v798_v14, %v789_v20  ;;  %v791_v25 = vpop.f32.mrb[2].mxu0  ;;  %v1018_v14 = vrot.slane %v1013_v62, %v2334_v9 }
 0x22a   : > { %vm806_vm11 = vcmp.ge.f32.partialorder %v800_v18, %v804_v22  ;;  %v792_v26 = vpop.f32.mrb[3].mxu0 }
 0x22b   : > { %v808_v27 = vsel %vm806_vm11, 1.0, %v2207_v21  ;;  %vm807_vm12 = vcmp.ge.f32.partialorder %v801_v23, %v804_v22 }
 0x22c   : > { %v2426_v28 = vmul.f32 %v931_v19, %v808_v27  ;;  %v809_v0 = vsel %vm807_vm12, 1.0, %v2207_v21 }
 0x22d   : > { %v2429_v30 = vmul.f32 %v935_v24, %v809_v0  ;;  %v2084_v31 = vpack.i.bf16 %v809_v0, %v808_v27 }
 0x22f   : > { %2085 = vrot.lane.b32.xlu0 %v2084_v31, %s2209_s25  ;;  %2080 = vrot.lane.b32.xlu1 %v2084_v31, %s2213_s29 }
 0x233   : > { %2095 = vrot.lane.b32.xlu0 %v2084_v31, %s2211_s27  ;;  %2090 = vrot.lane.b32.xlu1 %v2084_v31, %s2208_s24 }
 0x237   : > { %2105 = vrot.lane.b32.xlu0 %v2084_v31, %s2215_s14  ;;  %2100 = vrot.lane.b32.xlu1 %v2084_v31, %s2214_s13 }
 0x23b   : > { %2115 = vrot.lane.b32.xlu0 %v2084_v31, %s2212_s28  ;;  %2110 = vrot.lane.b32.xlu1 %v2084_v31, %s2210_s26 }
 0x2a1   : > { %v2086_v44 = vpop.permute.xlu0 %2085  ;;  %v2081_v45 = vpop.permute.xlu1 %2080 }
 0x2a2   : > { %v2088_v50 = vunpack.i.h.bf16 %v2086_v44  ;;  %v2087_v51 = vunpack.i.l.bf16 %v2086_v44  ;;  %v2083_v52 = vunpack.i.h.bf16 %v2081_v45  ;;  %v2082_v53 = vunpack.i.l.bf16 %v2081_v45 }
 0x2a4   : > { %v843_v58 = vsel %vm468_vm2, %v2087_v51, %v2088_v50  ;;  %v844_v59 = vsel %vm468_vm2, %v2088_v50, %v2087_v51  ;;  %v814_v60 = vsel %vm438_vm6, %v2082_v53, %v2083_v52  ;;  %v815_v61 = vsel %vm438_vm6, %v2083_v52, %v2082_v53 }
 0x2a5   : > { %v857_v63 = vmul.f32 %v850_v37, %v844_v59  ;;  %v858_v1 = vmul.f32 %v854_v38, %v843_v58  ;;  %v828_v3 = vmul.f32 %v821_v39, %v815_v61  ;;  %v829_v4 = vmul.f32 %v825_v40, %v814_v60  ;;  %v2096_v5 = vpop.permute.xlu0 %2095  ;;  %v2091_v6 = vpop.permute.xlu1 %2090 }
 0x2a6   : > { %v2098_v7 = vunpack.i.h.bf16 %v2096_v5  ;;  %v2097_v8 = vunpack.i.l.bf16 %v2096_v5  ;;  %v2093_v11 = vunpack.i.h.bf16 %v2091_v6  ;;  %v2092_v12 = vunpack.i.l.bf16 %v2091_v6 }
 0x2a7   : > { %v2141_v33 = vpack.c.bf16 %v858_v1, %v829_v4  ;;  %v2142_v34 = vpack.c.bf16 %v857_v63, %v828_v3 }
 0x2a8   : > { %v901_v15 = vsel %vm531_vm4, %v2097_v8, %v2098_v7  ;;  %v902_v17 = vsel %vm531_vm4, %v2098_v7, %v2097_v8  ;;  %v872_v18 = vsel %vm500_vm1, %v2092_v12, %v2093_v11  ;;  %v873_v19 = vsel %vm500_vm1, %v2093_v11, %v2092_v12 }
 0x2a9   : > { %v915_v20 = vmul.f32 %v908_v41, %v902_v17  ;;  %v916_v22 = vmul.f32 %v912_v46, %v901_v15  ;;  %v886_v23 = vmul.f32 %v879_v47, %v873_v19  ;;  %v887_v24 = vmul.f32 %v883_v48, %v872_v18  ;;  %v2106_v25 = vpop.permute.xlu0 %2105  ;;  %v2101_v26 = vpop.permute.xlu1 %2100  ;;  %1131 = vmatprep.subr.bf16.mxu1 %v2141_v33  ;;  %v1532_v17 = vld [vmem:[%s2727_s9] sm:$0xff]  ;;  %v1178_v19 = vld [vmem:[#allocation3] ss:$8 sm:$0x3] }
 0x2aa   : > { %v2108_v27 = vunpack.i.h.bf16 %v2106_v25  ;;  %v2107_v0 = vunpack.i.l.bf16 %v2106_v25  ;;  %v2103_v31 = vunpack.i.h.bf16 %v2101_v26  ;;  %v2102_v32 = vunpack.i.l.bf16 %v2101_v26  ;;  %1132 = vmatpush1.bf16.msra.mxu1 %v2142_v34  ;;  %v1628_v18 = vld [vmem:[%s2728_s10] sm:$0xff]  ;;  %v1236_v34 = vld [vmem:[#allocation3 + $0x2] ss:$8 sm:$0x3] }
 0x2ab   : > { %v2143_v51 = vpack.c.bf16 %v916_v22, %v887_v24  ;;  %v2144_v52 = vpack.c.bf16 %v915_v20, %v886_v23  ;;  %v1183_v20 = vrot.slane %v1178_v19, %v2334_v9  ;;  %v1187_v22 = vrot.slane %v1178_v19, %v2336_v10  ;;  %v1207_v24 = vld [vmem:[#allocation3 + $0x1] ss:$8 sm:$0x3] }
 0x2ac   : > { %v982_v35 = vsel %vm621_vm8, %v2107_v0, %v2108_v27  ;;  %v983_v36 = vsel %vm621_vm8, %v2108_v27, %v2107_v0  ;;  %v953_v37 = vsel %vm589_vm7, %v2102_v32, %v2103_v31  ;;  %v954_v38 = vsel %vm589_vm7, %v2103_v31, %v2102_v32 }
 0x2ad   : > { %v996_v39 = vmul.f32 %v989_v49, %v982_v35  ;;  %v967_v40 = vmul.f32 %v960_v55, %v953_v37  ;;  %v968_v41 = vmul.f32 %v964_v56, %v954_v38  ;;  %v2116_v42 = vpop.permute.xlu0 %2115  ;;  %v2111_v44 = vpop.permute.xlu1 %2110  ;;  %v997_v50 = vmul.f32 %v993_v54, %v983_v36  ;;  %1133 = vmatprep.subr.bf16.mxu1 %v2143_v51 }
 0x2ae   : > { %v2118_v45 = vunpack.i.h.bf16 %v2116_v42  ;;  %v2117_v46 = vunpack.i.l.bf16 %v2116_v42  ;;  %v2113_v47 = vunpack.i.h.bf16 %v2111_v44  ;;  %v2112_v48 = vunpack.i.l.bf16 %v2111_v44  ;;  %1134 = vmatpush1.bf16.msra.mxu1 %v2144_v52 }
 0x2af   : > { %v2145_v54 = vpack.c.bf16 %v968_v41, %v2429_v30  ;;  %v2146_v62 = vpack.c.bf16 %v967_v40, %v2426_v28  ;;  %v1065_v30 = vld [vmem:[%s2722_s4] sm:$0xf]  ;;  %v1288_v28 = vld [vmem:[#allocation3 + $0x4] ss:$8 sm:$0x3]  ;;  %v1212_v32 = vrot.slane %v1207_v24, %v2334_v9  ;;  %v1241_v41 = vrot.slane %v1236_v34, %v2334_v9 }
 0x2b0   : > { %v1040_v53 = vsel %vm684_vm5, %v2117_v46, %v2118_v45  ;;  %v1041_v49 = vsel %vm684_vm5, %v2118_v45, %v2117_v46  ;;  %v1011_v55 = vsel %vm652_vm3, %v2112_v48, %v2113_v47  ;;  %v1012_v56 = vsel %vm652_vm3, %v2113_v47, %v2112_v48 }
 0x2b1   : > { %v1054_v58 = vmul.f32 %v1047_v57, %v1040_v53  ;;  %v1055_v59 = vmul.f32 %v1051_v13, %v1041_v49  ;;  %v1025_v60 = vmul.f32 %v1018_v14, %v1011_v55  ;;  %v1026_v61 = vmul.f32 %v1022_v43, %v1012_v56  ;;  %1135 = vmatprep.subr.bf16.mxu1 %v2145_v54  ;;  %v1265_v43 = vld [vmem:[#allocation3 + $0x3] ss:$8 sm:$0x3] }
 0x2b2   : > { %1136 = vmatpush1.bf16.msra.mxu1 %v2146_v62  ;;  %v1293_v5 = vrot.slane %v1288_v28, %v2334_v9  ;;  %v1297_v6 = vrot.slane %v1288_v28, %v2336_v10  ;;  %v1245_v42 = vrot.slane %v1236_v34, %v2336_v10  ;;  %v1274_v51 = vrot.slane %v1265_v43, %v2336_v10 }
 0x2b3   : > { %v2147_v63 = vpack.c.bf16 %v1026_v61, %v997_v50  ;;  %v2148_v1 = vpack.c.bf16 %v1025_v60, %v996_v39  ;;  %v2149_v3 = vpack.c.bf16 %v1055_v59, %v1055_v59  ;;  %v2150_v4 = vpack.c.bf16 %v1054_v58, %v1054_v58  ;;  %v1317_v58 = vld [vmem:[#allocation3 + $0x5] ss:$8 sm:$0x3] }
 0x2b4   : > { %v1270_v50 = vrot.slane %v1265_v43, %v2334_v9 }
 0x2b5   : > { %1137 = vmatprep.subr.bf16.mxu1 %v2147_v63  ;;  %v1126_v57 = vsel %vm1124_vm13, %v2150_v4, 0  ;;  %v1346_v4 = vld [vmem:[#allocation3 + $0x6] ss:$8 sm:$0x3] }
 0x2b6   : > { %1138 = vmatpush1.bf16.msra.mxu1 %v2148_v1  ;;  %v1322_v1 = vrot.slane %v1317_v58, %v2334_v9 }
 0x2b7   : > { %1880 = vmatprep.subr.msk.bf16.mxu1 %vm1124_vm13, %v2149_v3  ;;  %v1326_v3 = vrot.slane %v1317_v58, %v2336_v10 }
 0x2ba   : > { %1140 = vmatpush1.bf16.msra.mxu1 %v1126_v57 }
 0x2bd   : > { %1881 = vmatmul.mubr.msk.bf16.vlgmr.msra.gmra.mrb[0].mxu1 %vm1120_vm14, %v1065_v30 }
 0x390   : > { %v1165_v7 = vpop.f32.mrb[0].mxu1 }
 0x391   : > { %v2505_v8 = vmul.f32 %v1293_v5, %v1165_v7  ;;  %1172 = vrot.lane.b32.xlu1 %v1165_v7, %s2213_s29  ;;  %v1167_v11 = vpop.f32.mrb[1].mxu1 }
 0x392   : > { %v2508_v12 = vmul.f32 %v1297_v6, %v1167_v11  ;;  %1174 = vrot.lane.b32.xlu0 %v1167_v11, %s2213_s29  ;;  %v1169_v13 = vpop.f32.mrb[2].mxu1 }
 0x393   : > { %v1170_v14 = vpop.f32.mrb[3].mxu1 }
 0x394   : > { %v1931_v15 = vpack.c.bf16 %v2508_v12, %v2505_v8 }
 0x395   : > { %1201 = vrot.lane.b32.xlu1 %v1165_v7, %s2209_s25 }
 0x396   : > { %1310 = vst [vmem:[#allocation2 + $0x20] sm:$0xff] %v1931_v15  ;;  %1203 = vrot.lane.b32.xlu0 %v1167_v11, %s2209_s25  ;;  %v1375_v15 = vld [vmem:[#allocation3 + $0x7] ss:$8 sm:$0x3] }
 0x399   : > { %1230 = vrot.lane.b32.xlu1 %v1165_v7, %s2208_s24 }
 0x39a   : > { %1232 = vrot.lane.b32.xlu0 %v1167_v11, %s2208_s24 }
 0x39d   : > { %1259 = vrot.lane.b32.xlu1 %v1165_v7, %s2211_s27 }
 0x39e   : > { %1261 = vrot.lane.b32.xlu0 %v1167_v11, %s2211_s27 }
 0x3a1   : > { %1311 = vrot.lane.b32.xlu1 %v1165_v7, %s2214_s13 }
 0x3a2   : > { %1313 = vrot.lane.b32.xlu0 %v1167_v11, %s2214_s13 }
 0x3a5   : > { %1340 = vrot.lane.b32.xlu1 %v1165_v7, %s2215_s14 }
 0x3a6   : > { %1342 = vrot.lane.b32.xlu0 %v1167_v11, %s2215_s14 }
 0x3a9   : > { %1369 = vrot.lane.b32.xlu1 %v1165_v7, %s2210_s26 }
 0x3aa   : > { %1371 = vrot.lane.b32.xlu0 %v1167_v11, %s2210_s26 }
 0x3ad   : > { %1398 = vrot.lane.b32.xlu1 %v1165_v7, %s2212_s28  ;;  %v1351_v7 = vrot.slane %v1346_v4, %v2334_v9 }
 0x3ae   : > { %1400 = vrot.lane.b32.xlu0 %v1167_v11, %s2212_s28  ;;  %v1355_v11 = vrot.slane %v1346_v4, %v2336_v10 }
 0x3b1   : > { %1535 = vperm.xlu1 %2078, %v1532_v17  }
 0x3b2   : > { %1631 = vperm.xlu0 %2119, %v1628_v18  }
 0x3b5   : > { %2120 = vset.pattern.permute.xlu1 %v2205_v2 }
 0x3b6   : > { %1541 = vperm.xlu1 %2120, %v1532_v17   ;;  %2131 = vset.pattern.permute.xlu0 %v2205_v2  ;;  %v1216_v2 = vrot.slane %v1207_v24, %v2336_v10  ;;  %v1380_v24 = vrot.slane %v1375_v15, %v2334_v9 }
 0x3ba   : > { %1637 = vperm.xlu1 %2120, %v1628_v18  }
 0x403   : > { %v1173_v23 = vpop.permute.xlu1 %1172 }
 0x404   : > { %v1175_v25 = vpop.permute.xlu0 %1174 }
 0x405   : > { %v1176_v26 = vsel %vm438_vm6, %v1173_v23, %v1175_v25  ;;  %v1177_v27 = vsel %vm438_vm6, %v1175_v25, %v1173_v23  ;;  %v1384_v25 = vrot.slane %v1375_v15, %v2336_v10  ;;  %v1684_v15 = vld [vmem:[%s2720_s2 + $0x90] sm:$0xff] }
 0x406   : > { %v1190_v0 = vmul.f32 %v1183_v20, %v1177_v27  ;;  %v1191_v31 = vmul.f32 %v1187_v22, %v1176_v26 }
 0x407   : > { %v1202_v33 = vpop.permute.xlu1 %1201 }
 0x408   : > { %v1927_v35 = vpack.c.bf16 %v1191_v31, %v1190_v0  ;;  %v1204_v36 = vpop.permute.xlu0 %1203 }
 0x409   : > { %v1205_v37 = vsel %vm468_vm2, %v1202_v33, %v1204_v36  ;;  %v1206_v38 = vsel %vm468_vm2, %v1204_v36, %v1202_v33 }
 0x40a   : > { %1200 = vst [vmem:[#allocation2] sm:$0xff] %v1927_v35  ;;  %v1219_v39 = vmul.f32 %v1212_v32, %v1206_v38  ;;  %v1220_v40 = vmul.f32 %v1216_v2, %v1205_v37  ;;  %v1404_v2 = vld [vmem:[#allocation3 + $0x10] ss:$8 sm:$0x3] }
 0x40b   : > { %v1231_v44 = vpop.permute.xlu1 %1230  ;;  %v1409_v38 = vrot.slane %v1404_v2, %v2334_v9 }
 0x40c   : > { %v1928_v45 = vpack.c.bf16 %v1220_v40, %v1219_v39  ;;  %v1233_v46 = vpop.permute.xlu0 %1232  ;;  %v2151_v49 = vpack.c.bf16 %v1219_v39, %v1190_v0  ;;  %v2152_v55 = vpack.c.bf16 %v1220_v40, %v1191_v31  ;;  %v1413_v39 = vrot.slane %v1404_v2, %v2336_v10  ;;  %v1671_v2 = vld [vmem:[%s2720_s2 + $0x28] sm:$0xff] }
 0x40d   : > { %v1234_v47 = vsel %vm500_vm1, %v1231_v44, %v1233_v46  ;;  %v1235_v48 = vsel %vm500_vm1, %v1233_v46, %v1231_v44  ;;  %v1548_v46 = vcombine.high %v2345_v16, %v2345_v16 }
 0x40e   : > { %1229 = vst [vmem:[#allocation2 + $0x8] sm:$0xff] %v1928_v45  ;;  %v1248_v52 = vmul.f32 %v1241_v41, %v1235_v48  ;;  %v1249_v53 = vmul.f32 %v1245_v42, %v1234_v47  ;;  %1491 = vmatprep.subr.bf16.mxu0 %v2152_v55  ;;  %v1427_v48 = vld [vmem:[%s2723_s5] sm:$0xf] }
 0x40f   : > { %v1260_v56 = vpop.permute.xlu1 %1259  ;;  %1492 = vmatpush1.bf16.msra.mxu0 %v2151_v49 }
 0x410   : > { %v1929_v59 = vpack.c.bf16 %v1249_v53, %v1248_v52  ;;  %v1262_v60 = vpop.permute.xlu0 %1261 }
 0x411   : > { %v1263_v61 = vsel %vm531_vm4, %v1260_v56, %v1262_v60  ;;  %v1264_v54 = vsel %vm531_vm4, %v1262_v60, %v1260_v56 }
 0x412   : > { %1258 = vst [vmem:[#allocation2 + $0x10] sm:$0xff] %v1929_v59  ;;  %v1277_v62 = vmul.f32 %v1270_v50, %v1264_v54  ;;  %v1278_v63 = vmul.f32 %v1274_v51, %v1263_v61  ;;  %v1546_v50 = vld [vmem:[%s2724_s6] sm:$0xff] }
 0x413   : > { %v1312_v57 = vpop.permute.xlu1 %1311 }
 0x414   : > { %v1930_v30 = vpack.c.bf16 %v1278_v63, %v1277_v62  ;;  %v1314_v28 = vpop.permute.xlu0 %1313  ;;  %v2153_v17 = vpack.c.bf16 %v1277_v62, %v1248_v52  ;;  %v2154_v18 = vpack.c.bf16 %v1278_v63, %v1249_v53 }
 0x415   : > { %v1315_v5 = vsel %vm589_vm7, %v1312_v57, %v1314_v28  ;;  %v1316_v6 = vsel %vm589_vm7, %v1314_v28, %v1312_v57 }
 0x416   : > { %1287 = vst [vmem:[#allocation2 + $0x18] sm:$0xff] %v1930_v30  ;;  %v1329_v13 = vmul.f32 %v1322_v1, %v1315_v5  ;;  %v1330_v14 = vmul.f32 %v1326_v3, %v1316_v6  ;;  %1493 = vmatprep.subr.bf16.mxu0 %v2154_v18  ;;  %v1682_v5 = vld [vmem:[%s2720_s2 + $0x80] sm:$0xff]  ;;  %v1683_v6 = vld [vmem:[%s2720_s2 + $0x88] sm:$0xff] }
 0x417   : > { %v1341_v19 = vpop.permute.xlu1 %1340  ;;  %1494 = vmatpush1.bf16.msra.mxu0 %v2153_v17  ;;  %v1685_v17 = vld [vmem:[%s2720_s2 + $0x98] sm:$0xff] }
 0x418   : > { %v1343_v20 = vpop.permute.xlu0 %1342  ;;  %v2155_v0 = vpack.c.bf16 %v1329_v13, %v2505_v8  ;;  %v2156_v31 = vpack.c.bf16 %v1330_v14, %v2508_v12  ;;  %v1971_v13 = vpack.c.bf16 %v1683_v6, %v1682_v5  ;;  %v1667_v14 = vld [vmem:[%s2720_s2 + $0x8] sm:$0xff] }
 0x419   : > { %v1344_v22 = vsel %vm621_vm8, %v1341_v19, %v1343_v20  ;;  %v1345_v23 = vsel %vm621_vm8, %v1343_v20, %v1341_v19  ;;  %v1975_v20 = vpack.c.bf16 %v1685_v17, %v1684_v15 }
 0x41a   : > { %v1358_v26 = vmul.f32 %v1351_v7, %v1344_v22  ;;  %v1359_v27 = vmul.f32 %v1355_v11, %v1345_v23  ;;  %1495 = vmatprep.subr.bf16.mxu0 %v2156_v31  ;;  %v1666_v7 = vld [vmem:[%s2720_s2] sm:$0xff]  ;;  %v1668_v22 = vld [vmem:[%s2720_s2 + $0x10] sm:$0xff]  ;;  %v1669_v23 = vld [vmem:[%s2720_s2 + $0x18] sm:$0xff]  ;;  %1972 = vmatprep.subr.bf16.mxu1 %v1971_v13 }
 0x41b   : > { %v1370_v32 = vpop.permute.xlu1 %1369  ;;  %1496 = vmatpush1.bf16.msra.mxu0 %v2155_v0  ;;  %v1973_v19 = vpack.c.bf16 %v1667_v14, %v1666_v7  ;;  %v1977_v0 = vpack.c.bf16 %v1669_v23, %v1668_v22 }
 0x41c   : > { %v1372_v33 = vpop.permute.xlu0 %1371 }
 0x41d   : > { %v1373_v34 = vsel %vm652_vm3, %v1370_v32, %v1372_v33  ;;  %v1374_v35 = vsel %vm652_vm3, %v1372_v33, %v1370_v32  ;;  %1974 = vmatpush3.bf16.msra.mxu1 %v1973_v19  ;;  %v1670_v32 = vld [vmem:[%s2720_s2 + $0x20] sm:$0xff]  ;;  %v1688_v33 = vld [vmem:[%s2720_s2 + $0xb0] sm:$0xff] }
 0x41e   : > { %v1387_v36 = vmul.f32 %v1380_v24, %v1373_v34  ;;  %v1388_v37 = vmul.f32 %v1384_v25, %v1374_v35  ;;  %v1686_v24 = vld [vmem:[%s2720_s2 + $0xa0] sm:$0xff]  ;;  %1976 = vmatprep.subr.bf16.mxu1 %v1975_v20  ;;  %v1689_v34 = vld [vmem:[%s2720_s2 + $0xb8] sm:$0xff]  ;;  %v1981_v35 = vpack.c.bf16 %v1671_v2, %v1670_v32 }
 0x41f   : > { %v1399_v8 = vpop.permute.xlu1 %1398 }
 0x420   : > { %v1401_v40 = vpop.permute.xlu0 %1400  ;;  %v2157_v44 = vpack.c.bf16 %v1387_v36, %v1358_v26  ;;  %v2158_v45 = vpack.c.bf16 %v1388_v37, %v1359_v27  ;;  %v1687_v26 = vld [vmem:[%s2720_s2 + $0xa8] sm:$0xff]  ;;  %v1983_v36 = vpack.c.bf16 %v1689_v34, %v1688_v33  ;;  %v1672_v37 = vld [vmem:[%s2720_s2 + $0x30] sm:$0xff] }
 0x421   : > { %v1402_v12 = vsel %vm684_vm5, %v1399_v8, %v1401_v40  ;;  %v1403_v41 = vsel %vm684_vm5, %v1401_v40, %v1399_v8  ;;  %v1979_v31 = vpack.c.bf16 %v1687_v26, %v1686_v24  ;;  %1978 = vmatpush3.bf16.msra.mxu1 %v1977_v0  ;;  %v1691_v8 = vld [vmem:[%s2720_s2 + $0xc8] sm:$0xff] }
 0x422   : > { %v1416_v42 = vmul.f32 %v1409_v38, %v1402_v12  ;;  %v1417_v43 = vmul.f32 %v1413_v39, %v1403_v41  ;;  %1497 = vmatprep.subr.bf16.mxu0 %v2158_v45  ;;  %v1673_v38 = vld [vmem:[%s2720_s2 + $0x38] sm:$0xff]  ;;  %v1690_v39 = vld [vmem:[%s2720_s2 + $0xc0] sm:$0xff] }
 0x423   : > { %1498 = vmatpush1.bf16.msra.mxu0 %v2157_v44  ;;  %1980 = vmatprep.subr.bf16.mxu1 %v1979_v31  ;;  %v1985_v40 = vpack.c.bf16 %v1673_v38, %v1672_v37  ;;  %v1987_v12 = vpack.c.bf16 %v1691_v8, %v1690_v39  ;;  %v1674_v41 = vld [vmem:[%s2720_s2 + $0x40] sm:$0xff]  ;;  %v1693_v44 = vld [vmem:[%s2720_s2 + $0xd8] sm:$0xff] }
 0x424   : > { %v2159_v9 = vpack.c.bf16 %v1417_v43, %v1417_v43  ;;  %v2160_v47 = vpack.c.bf16 %v1416_v42, %v1416_v42  ;;  %v1675_v42 = vld [vmem:[%s2720_s2 + $0x48] sm:$0xff]  ;;  %v1692_v43 = vld [vmem:[%s2720_s2 + $0xd0] sm:$0xff] }
 0x425   : > { %1982 = vmatpush3.bf16.msra.mxu1 %v1981_v35  ;;  %v1989_v45 = vpack.c.bf16 %v1675_v42, %v1674_v41 }
 0x426   : > { %1901 = vmatprep.subr.msk.bf16.mxu0 %vm1124_vm13, %v2159_v9  ;;  %v1486_v10 = vsel %vm1124_vm13, %v2160_v47, 0  ;;  %1984 = vmatprep.subr.bf16.mxu1 %v1983_v36  ;;  %v1676_v9 = vld [vmem:[%s2720_s2 + $0x50] sm:$0xff]  ;;  %v1677_v47 = vld [vmem:[%s2720_s2 + $0x58] sm:$0xff] }
 0x427   : > { %1500 = vmatpush1.bf16.msra.mxu0 %v1486_v10  ;;  %v1694_v10 = vld [vmem:[%s2720_s2 + $0xe0] sm:$0xff] }
 0x428   : > { %1903 = vmatprep.subr.msk.mxu0 %vm1124_vm13, %v1548_v46  ;;  %v1991_v46 = vpack.c.bf16 %v1693_v44, %v1692_v43 }
 0x429   : > { %1986 = vmatpush3.bf16.msra.mxu1 %v1985_v40 }
 0x42a   : > { %1902 = vmatmul.mubr.msk.bf16.vlgmr.msra.gmra.mrb[4].mxu0 %vm1120_vm14, %v1427_v48  ;;  %1988 = vmatprep.subr.bf16.mxu1 %v1987_v12  ;;  %v1695_v48 = vld [vmem:[%s2720_s2 + $0xe8] sm:$0xff] }
 0x42b   : > { %1904 = vmatpush1.msk.msra.mxu0 %vm1124_vm13, %v2345_v16  ;;  %1621 = vmatprep.mubr.f32.mxu0 %v2207_v21 }
 0x42d   : > { %1990 = vmatpush3.bf16.msra.mxu1 %v1989_v45 }
 0x42e   : > { %1992 = vmatprep.subr.bf16.mxu1 %v1991_v46 }
 0x430   : > { %v1536_v51 = vpop.permute.xlu1 %1535 }
 0x431   : > { %v1632_v58 = vpop.permute.xlu0 %1631 }
 0x432   : > { %1905 = vmatmul.mubr.msk.f32.vlgmr.msra.gmra.mrb[8].mxu0 %vm1549_vm15, %v1546_v50  ;;  %v1993_v50 = vpack.c.bf16 %v1677_v47, %v1676_v9 }
 0x434   : > { %1994 = vmatpush3.bf16.msra.mxu1 %v1993_v50 }
 0x435   : > { %v1542_v56 = vpop.permute.xlu1 %1541 }
 0x439   : > { %v1638_v62 = vpop.permute.xlu1 %1637 }
 0x4fd   : > { %v1525_v52 = vpop.f32.mrb[4].mxu0 }
 0x4fe   : > { %v1527_v53 = vpop.f32.mrb[5].mxu0  ;;  %v1538_v59 = vmul.f32 %v1536_v51, %v1525_v52  ;;  %v1678_v52 = vld [vmem:[%s2720_s2 + $0x60] sm:$0xff] }
 0x4ff   : > { %v1529_v49 = vpop.f32.mrb[6].mxu0  ;;  %v1539_v60 = vmul.f32 %v1536_v51, %v1527_v53  ;;  %v1995_v51 = vpack.c.bf16 %v1695_v48, %v1694_v10  ;;  %v1679_v53 = vld [vmem:[%s2720_s2 + $0x68] sm:$0xff] }
 0x500   : > { %v1530_v55 = vpop.f32.mrb[7].mxu0  ;;  %v1544_v63 = vadd.f32 %v1542_v56, %v1538_v59  ;;  %v1997_v49 = vpack.c.bf16 %v1679_v53, %v1678_v52  ;;  %v1680_v59 = vld [vmem:[%s2720_s2 + $0x70] sm:$0xff] }
 0x501   : > { %v1545_v3 = vadd.f32 %v1542_v56, %v1539_v60  ;;  %1996 = vmatprep.subr.bf16.mxu1 %v1995_v51  ;;  %v1696_v55 = vld [vmem:[%s2720_s2 + $0xf0] sm:$0xff]  ;;  %v1697_v56 = vld [vmem:[%s2720_s2 + $0xf8] sm:$0xff] }
 0x502   : > { %1998 = vmatpush3.bf16.msra.mxu1 %v1997_v49  ;;  %v1681_v60 = vld [vmem:[%s2720_s2 + $0x78] sm:$0xff] }
 0x505   : > { %v1623_v61 = vpop.f32.mrb[8].mxu0 }
 0x506   : > { %v1634_v54 = vmul.f32 %v1632_v58, %v1623_v61  ;;  %v1625_v16 = vpop.f32.mrb[9].mxu0  ;;  %v2001_v61 = vpack.c.bf16 %v1681_v60, %v1680_v59 }
 0x507   : > { %v1635_v21 = vmul.f32 %v1632_v58, %v1625_v16  ;;  %v1999_v58 = vpack.c.bf16 %v1697_v56, %v1696_v55 }
 0x508   : > { %v1640_v1 = vadd.f32 %v1638_v62, %v1634_v54 }
 0x509   : > { %v1641_v4 = vadd.f32 %v1638_v62, %v1635_v21  ;;  %2000 = vmatprep.subr.bf16.mxu1 %v1999_v58 }
 0x50a   : > { %v1642_v57 = vadd.f32 %v1640_v1, %v1544_v63  ;;  %2002 = vmatpush3.bf16.msra.mxu1 %v2001_v61 }
 0x50b   : > { %v1643_v30 = vadd.f32 %v1641_v4, %v1545_v3 }
 0x50c   : > { %v1646_v28 = vmul.f32 0.1, %v1642_v57  ;;  %vm1644_vm0 = vcmp.ge.f32.partialorder %v1642_v57, 0.0 }
 0x50d   : > { %v1647_v11 = vmul.f32 0.1, %v1643_v30  ;;  %vm1645_vm1 = vcmp.ge.f32.partialorder %v1643_v30, 0.0 }
 0x50e   : > { %v2618_v18 = vsel %vm1644_vm0, %v1642_v57, %v1646_v28 }
 0x50f   : > { %v1649_v25 = vsel %vm1645_vm1, %v1643_v30, %v1647_v11 }
 0x510   : > { %v2121_v27 = vpack.i.bf16 %v1649_v25, %v2618_v18 }
 0x512   : > { %2122 = vrot.lane.b32.xlu0 %v2121_v27, %s2214_s13 }
 0x584   : > { %v2123_v54 = vpop.permute.xlu0 %2122 }
 0x585   : > { %v2125_v16 = vunpack.i.h.bf16 %v2123_v54  ;;  %v2124_v62 = vunpack.i.l.bf16 %v2123_v54 }
 0x587   : > { %v1654_v21 = vsel %vm589_vm7, %v2124_v62, %v2125_v16  ;;  %v1655_v63 = vsel %vm589_vm7, %v2125_v16, %v2124_v62 }
 0x588   : > { %v1656_v1 = vmax.f32 %v2618_v18, %v1654_v21  ;;  %v1657_v3 = vmax.f32 %v1649_v25, %v1655_v63 }
 0x58a   : > { %v2126_v4 = vpack.i.bf16 %v1657_v3, %v1656_v1 }
 0x58c   : > { %2127 = vrot.lane.b32.xlu1 %v2126_v4, %s2210_s26 }
 0x5fe   : > { %v2128_v57 = vpop.permute.xlu1 %2127 }
 0x5ff   : > { %v2130_v30 = vunpack.i.h.bf16 %v2128_v57  ;;  %v2129_v28 = vunpack.i.l.bf16 %v2128_v57 }
 0x601   : > { %v1662_v5 = vsel %vm652_vm3, %v2129_v28, %v2130_v30  ;;  %v1663_v6 = vsel %vm652_vm3, %v2130_v30, %v2129_v28 }
 0x602   : > { %v1664_v7 = vmax.f32 %v1656_v1, %v1662_v5  ;;  %v1665_v11 = vmax.f32 %v1657_v3, %v1663_v6 }
 0x604   : > { %1762 = vmatprep.mubr.f32.mxu1 %v1665_v11 }
 0x605   : > { %1763 = vmatmul.mubr.f32.vlgmr.msra.gmra.mrb[4].mxu1 %v1664_v7 }
 0x6d8   : > { %v1968_v13 = vpop.f32.mrb[4].mxu1 }
 0x6d9   : > { %v1969_v14 = vpop.f32.mrb[5].mxu1 }
 0x6da   : > { %v1970_v15 = vadd.f32 %v1969_v14, %v1968_v13 }
 0x6dc   : > { %1768 = vst [vmem:[%s399_s23] sm:$0xff] %v1970_v15 }
 0x6dd PF: > { %s22_s17 = sadd.s32 1, %s2199_s17  }
 0x6de   : > { %p19_p3 = scmp.ge.s32.totalorder %s22_s17, 4  }
 0x6e0   :  { %21 = sbr.rel (!%p19_p3) target bundleno = 1 (0x1), region = 107 }
 0x6e7   :  { %1788 = vsyncpa [#allocation4], 1 }
 0x6e8   :  { %1790 = vsyncpa [#allocation4 + $0x1], 1 }

</bundles_post_ra>
